<compile_context>
chip_gen: v6e
topology: v6e:2x2x1
jax: 0.10.0
libtpu: 0.0.40
codegen_flags: <defaults>
</compile_context>

<pallas_src>
import functools

import jax
import jax.numpy as jnp
from jax.experimental import pallas as pl
from jax.experimental.pallas import tpu as pltpu

IN_FEATURES = 2560
OUT_FEATURES = 1024


# --------------------------------------------------------------------------
# Pallas kernel: single-shot  out_tile = cast_bf16(x) @ w_tile + b_tile
# (full K per block; bf16 MXU stream, f32 accumulation, f32 output)
# --------------------------------------------------------------------------
def _linear_kernel(x_ref, w_ref, b_ref, o_ref):
    x = x_ref[...].astype(jnp.bfloat16)          # cast fused into the kernel
    o_ref[...] = (
        jnp.dot(x, w_ref[...], preferred_element_type=jnp.float32) + b_ref[...]
    ).astype(o_ref.dtype)


def pallas_linear(x, w_t, b, *, tn):
    """out = x @ w_t + b  with x:[M,K] (f32), w_t:[K,N] (bf16), b:[N] (f32)."""
    M, K = x.shape
    Kw, N = w_t.shape
    assert K == Kw and N % tn == 0

    # Pad batch rows to a multiple of 16 (native bf16 sublane tile) if needed.
    Mp = max(16, ((M + 15) // 16) * 16)
    if Mp != M:
        x = jnp.pad(x, ((0, Mp - M), (0, 0)))
    b2d = b.reshape(1, N)

    grid = (N // tn,)
    cost = pl.CostEstimate(
        flops=2 * Mp * K * N,
        transcendentals=0,
        bytes_accessed=Mp * K * 4 + K * N * 2 + N * 4 + Mp * N * 4,
    )
    out = pl.pallas_call(
        _linear_kernel,
        out_shape=jax.ShapeDtypeStruct((Mp, N), jnp.float32),
        grid_spec=pltpu.PrefetchScalarGridSpec(
            num_scalar_prefetch=0,
            grid=grid,
            in_specs=[
                pl.BlockSpec((Mp, K), lambda j: (0, 0)),   # f32 activations, full K
                pl.BlockSpec((K, tn), lambda j: (0, j)),   # bf16 weight strip
                pl.BlockSpec((1, tn), lambda j: (0, j)),   # bias
            ],
            out_specs=pl.BlockSpec((Mp, tn), lambda j: (0, j)),
        ),
        compiler_params=pltpu.CompilerParams(
            dimension_semantics=("parallel",),          # shards tiles across TCs on v7x
            vmem_limit_bytes=32 * 1024 * 1024,
        ),
        cost_estimate=cost,
    )(x, w_t, b2d)
    return out[:M] if Mp != M else out


def _default_tn():
    """Generation-dependent output tile width.

    Single-TensorCore chips (v5e / v6e): one 1024-wide tile, grid=(1,) — no
    grid-step overhead, no pipeline bubble.  Dual-TC / megacore chips (v7x,
    v4/v5p): two 512-wide tiles so the "parallel" N axis shards across cores.
    """
    try:
        kind = jax.devices()[0].device_kind.lower()
    except Exception:
        return 1024
    single_tc = any(s in kind for s in ("v5e", "v5 lite", "v6e", "v6 lite", "v6"))
    return 1024 if single_tc else 512


# --------------------------------------------------------------------------
# ImageEncoder parameters / forward
# --------------------------------------------------------------------------
def init_params(key, in_channels):
    k1, k2, k3 = jax.random.split(key, 3)
    # Stand-in backbone projection: [C] -> [2560]
    backbone_w = jax.random.normal(k1, (in_channels, IN_FEATURES), jnp.float32) * 0.02
    # nn.Linear(2560, 1024): PyTorch weight is [out, in]; store pre-transposed
    # ([in, out]) and in bf16 (documented numerics downgrade vs f32) so the
    # Pallas matmul streams it with no per-call transpose/cast and half the
    # HBM bytes.
    bound = 1.0 / (IN_FEATURES ** 0.5)
    fc_w = jax.random.uniform(
        k2, (OUT_FEATURES, IN_FEATURES), jnp.float32, -bound, bound
    )
    fc_b = jax.random.uniform(k3, (OUT_FEATURES,), jnp.float32, -bound, bound)
    return {
        "backbone_w": backbone_w,
        "fc_w_t": fc_w.T.astype(jnp.bfloat16),   # [2560, 1024] bf16
        "fc_b": fc_b,                            # [1024] f32
    }


@functools.partial(jax.jit, static_argnames=("tn",))
def image_encoder_forward(params, x, *, tn):
    # x: NCHW [B, C, H, W]
    # Stand-in for self.model(x): global average pool over (H, W) then a fixed
    # projection to the 2560-d feature space EfficientNet-B7 would produce.
    feats = jnp.mean(x, axis=(2, 3))                       # [B, C]
    feats = feats @ params["backbone_w"]                   # [B, 2560] f32
    # self.flatten is a no-op on [B, 2560]
    # self.fc: Pallas matmul on the MXU (bf16 weight stream, f32 accumulation)
    return pallas_linear(feats, params["fc_w_t"], params["fc_b"], tn=tn)


if __name__ == "__main__":
    key = jax.random.PRNGKey(0)
    k_x, k_p = jax.random.split(key)

    B, C, H, W = 2, 4, 16, 16
    x = jax.random.normal(k_x, (B, C, H, W), jnp.float32)

    params = init_params(k_p, C)
    tn = _default_tn()

    out = image_encoder_forward(params, x, tn=tn)
    out = jax.block_until_ready(out)

    assert out.shape == (B, OUT_FEATURES), out.shape

    # sanity: compare fc against plain JAX reference with the same bf16 inputs
    feats = jnp.mean(x, axis=(2, 3)) @ params["backbone_w"]
    ref = (
        jnp.dot(
            feats.astype(jnp.bfloat16),
            params["fc_w_t"],
            preferred_element_type=jnp.float32,
        )
        + params["fc_b"]
    )
    assert jnp.allclose(out, ref, atol=1e-2, rtol=1e-2)

    print("KERNEL_OK")
</pallas_src>

<mosaic_0001>
module attributes {stable_mosaic.version = 11 : i64} {
  func.func @_linear_kernel(%arg0: i32, %arg1: memref<16x2560xf32, #tpu.memory_space<vmem>>, %arg2: memref<2560x512xbf16, #tpu.memory_space<vmem>>, %arg3: memref<1x512xf32, #tpu.memory_space<vmem>>, %arg4: memref<16x512xf32, #tpu.memory_space<vmem>>) attributes {dimension_semantics = [#tpu.dimension_semantics<parallel>], iteration_bounds = array<i64: 2>, scalar_prefetch = 0 : i64, scratch_operands = 0 : i64, tpu.core_type = #tpu.core_type<tc>, window_params = [{pipeline_mode = #tpu.pipeline_mode<synchronous>, transform_indices = @transform_0, window_bounds = array<i64: 16, 2560>}, {transform_indices = @transform_1, window_bounds = array<i64: 2560, 512>}, {transform_indices = @transform_2, window_bounds = array<i64: 1, 512>}, {transform_indices = @transform_3, window_bounds = array<i64: 16, 512>}]} {
    %c0 = arith.constant 0 : index
    %c0_0 = arith.constant 0 : index
    %0 = vector.load %arg1[%c0, %c0_0] : memref<16x2560xf32, #tpu.memory_space<vmem>>, vector<16x2560xf32>
    %1 = arith.truncf %0 : vector<16x2560xf32> to vector<16x2560xbf16>
    %c0_1 = arith.constant 0 : index
    %c0_2 = arith.constant 0 : index
    %2 = vector.load %arg2[%c0_1, %c0_2] : memref<2560x512xbf16, #tpu.memory_space<vmem>>, vector<2560x512xbf16>
    %cst = arith.constant dense<0.000000e+00> : vector<16x512xf32>
    %3 = tpu.matmul %1, %2, %cst {dimension_numbers = #tpu.dot_dimension_numbers<[1], [0], [0], [1], [0, 0, 1, 1], [], []>} : vector<16x2560xbf16>, vector<2560x512xbf16>, vector<16x512xf32> -> vector<16x512xf32>
    %c0_3 = arith.constant 0 : index
    %c0_4 = arith.constant 0 : index
    %4 = vector.load %arg3[%c0_3, %c0_4] : memref<1x512xf32, #tpu.memory_space<vmem>>, vector<1x512xf32>
    %5 = vector.broadcast %4 : vector<1x512xf32> to vector<16x512xf32>
    %6 = arith.addf %3, %5 : vector<16x512xf32>
    %c0_5 = arith.constant 0 : index
    %c0_6 = arith.constant 0 : index
    %7 = vector.load %arg4[%c0_5, %c0_6] : memref<16x512xf32, #tpu.memory_space<vmem>>, vector<16x512xf32>
    tpu.vector_store %arg4[%c0_5, %c0_6], %6 {strides = array<i32>} : memref<16x512xf32, #tpu.memory_space<vmem>>, vector<16x512xf32>,
    return
  }
  func.func @transform_0(%arg0: i32) -> (i32, i32) {
    %c0_i32 = arith.constant 0 : i32
    %c0_i32_0 = arith.constant 0 : i32
    %c0_i32_1 = arith.constant 0 : i32
    return %c0_i32, %c0_i32_0 : i32, i32
  }
  func.func @transform_1(%arg0: i32) -> (i32, i32) {
    %c0_i32 = arith.constant 0 : i32
    %c0_i32_0 = arith.constant 0 : i32
    return %c0_i32, %arg0 : i32, i32
  }
  func.func @transform_2(%arg0: i32) -> (i32, i32) {
    %c0_i32 = arith.constant 0 : i32
    %c0_i32_0 = arith.constant 0 : i32
    return %c0_i32, %arg0 : i32, i32
  }
  func.func @transform_3(%arg0: i32) -> (i32, i32) {
    %c0_i32 = arith.constant 0 : i32
    %c0_i32_0 = arith.constant 0 : i32
    return %c0_i32, %arg0 : i32, i32
  }
}

</mosaic_0001>

<bundles_post_ra>
// kernel: image_encoder_forward.1
= control target key start
LH: loop header
LB: loop body
LE: loop exit
PB: predicated region body
PF: predicated region fallthrough
CT: control target
= control target key end

     0   :  { %8 = vsyncpa [#allocation3], 0  ;;  %s8011_s0 = inlined_call_operand.vmem [shape: f32[16,2560], index: 0, kind: input, shape index: {}]   ;;  %s8012_s1 = inlined_call_operand.hbm [shape: bf16[2560,1024], index: 1, kind: input, shape index: {}]   ;;  %s8013_s2 = inlined_call_operand.hbm [shape: f32[1,1024], index: 2, kind: input, shape index: {}]   ;;  %s8014_s3 = inlined_call_operand.vmem [shape: f32[16,1024], index: 3, kind: output, shape index: {}]  }
   0x1   :  { %10 = vsyncpa [#allocation3 + $0x1], 0 }
   0x2   :  { %11 = vsyncpa [#allocation5], 0 }
   0x3   :  { %13 = vsyncpa [#allocation5 + $0x1], 0  ;;  %s6931_s12 = smov 0   ;;  %s6933_s13 = smov 0  }
   0x4   :  { %s6935_s14 = smov 0   ;;  %s6937_s15 = smov 0  }
   0x5 LB: > { %s6950_s16 = sadd.s32 4294967295, %s6904_s15   ;;  %s6953_s17 = sadd.s32 1, %s6904_s15   ;;  %s6904_s15 = sphi %s6937_s15, %s8026_s15   ;;  %s6900_s14 = sphi %s6935_s14, %s8025_s14   ;;  %s6896_s13 = sphi %s6933_s13, %s8024_s13   ;;  %s6892_s12 = sphi %s6931_s12, %s8023_s12  }
   0x6   : > { %s44_s18 = ssub.s32 %s6904_s15, %s6953_s17  ;;  %s47_s19 = sadd.s32 1, %s6900_s14 }
   0x7   : > { %p45_p0 = scmp.eq.s32.totalorder %s44_s18, 0  ;;  %p54_p1 = scmp.ne.s32.totalorder %s6900_s14, %s6896_s13 }
   0x8   : > { %p55_p2 = scmp.eq.s32.totalorder %s6904_s15, 0  ;;  %p60_p3 = scmp.ne.s32.totalorder %s6896_s13, %s6892_s12 }
   0x9   : > { %s6963_s20 = scalar_select %p45_p0, %s6900_s14, %s47_s19  }
   0xa   : > { %p56_p4 = por %p55_p2, %p54_p1  ;;  %p61_p5 = scmp.eq.s32.totalorder %s6950_s16, 0 }
   0xb   : > { %p110_p6 = scmp.eq.s32.totalorder %s6950_s16, 1  ;;  %p5814_p8 = scmp.lt.s32.totalorder %s6904_s15, 2 }
   0xc   : > { %p6967_p7 = por %p61_p5, %p60_p3  ;;  %s6977_s23 = sand.u32 1, %s6900_s14  }
   0xd   : > { %p6972_p9 = por %p110_p6, %p54_p1  ;;  %s5801_s24 = smul.u32 5120, %s6977_s23 }
   0xe   : > { %s8016_s21 = scalar_select %p6967_p7, 1, 0 }
   0xf   : > { %s8017_s22 = scalar_select %p6972_p9, 1, 0 }
  0x10   : > { %s5798_s25 = sshll.u32 %s6904_s15, 8  ;;  %p6981_p10 = pnand %p5814_p8, %p56_p4 }
  0x11   : > { %s6988_s29 = scalar_lea.hbm %s8012_s1, %s5798_s25  ;;  %s143_s30 = scalar_lea.vmem [#allocation2], %s5801_s24 }
  0x12   : > { %s150_s4 = sshll.u32 %s143_s30, 4  ;;  %s140_s5 = scalar_lea.sflag [#allocation3], %s6977_s23  ;;  %s6990_s4 = int_to_ptr.vmem [resolvable:$true] %s150_s4 }
  0x13   : > { %s6810_s6 = scalar_lea.hbm %s6988_s29, 81920  ;;  %p6812_p12 = pneg %p6981_p10 }
  0x14   : > { %p6811_p11 = scmp.ne.s32.totalorder %s6988_s29, %s6810_s6  ;;  %s6815_s9 = scalar_lea.hbm %s8012_s1, 163840 }
  0x15   : > { %p6816_p1 = scmp.lt.s32.totalorder %s6988_s29, %s8012_s1  ;;  %p6817_p2 = scmp.lt.s32.totalorder %s6815_s9, %s6810_s6 }
  0x16   : > { %p6813_p13 = pnand %p6812_p12, %p6811_p11 }
  0x17   : > { %p6818_p3 = por %p6817_p2, %p6816_p1 }
  0x18   : > { %p6814_p0 = pneg %p6813_p13 }
  0x1a   : > { %p6819_p4 = pnand %p6818_p3, %p6814_p0 }
  0x1c   : > { %6822 = shalt.err (!%p6819_p4)
}
  0x1d   : > { %s6823_s12 = scalar_lea.vmem %s6990_s4, 81920  ;;  %s6906_s18 = smov [#allocation2]  }
  0x1e   : > { %p6824_p5 = scmp.ne.s32.totalorder %s6990_s4, %s6823_s12  ;;  %s6828_s19 = sshll.u32 %s6906_s18, 4  ;;  %s6829_s19 = int_to_ptr.vmem [resolvable:$false] %s6828_s19 }
  0x1f   : > { %s6830_s24 = scalar_lea.vmem %s6829_s19, 163840  ;;  %p6831_p11 = scmp.lt.s32.totalorder %s6990_s4, %s6829_s19 }
  0x20   : > { %p6826_p6 = pnand %p6824_p5, %p6812_p12  ;;  %p6832_p13 = scmp.lt.s32.totalorder %s6830_s24, %s6823_s12 }
  0x22   : > { %p6827_p8 = pneg %p6826_p6  ;;  %p6833_p9 = por %p6832_p13, %p6831_p11 }
  0x24   : > { %p6834_p1 = pnand %p6833_p9, %p6827_p8 }
  0x26   : > { %6837 = shalt.err (!%p6834_p1)
}
  0x27   : > { %s6907_s25 = smov 512   ;;  %s6908_s27 = smov 256  }
  0x28   : > { %s6909_s28 = smov 16   ;;  %p5150_p0 = scmp.ge.s32.totalorder %s6904_s15, 1 }
  0x29   : > { %5810 = dma.hbm_to_vmem [thread:$0]  (!%p6981_p10), %s6988_s29, 81920, %s6990_s4, %s140_s5, %s6907_s25, %s6908_s27, %s6909_s28  }
  0x2a   : > { %p177_p2 = scmp.lt.s32.totalorder %s6904_s15, 3  ;;  %s5147_s30 = sshll.u32 %s6977_s23, 2 }
  0x2b   : > { %s5799_s7 = sshll.u32 %s6904_s15, 6  ;;  %s164_s8 = scalar_lea.vmem [#allocation4], %s5147_s30 }
  0x2c   : > { %p7022_p9 = pnand %p5150_p0, %p177_p2  ;;  %s172_s9 = sshll.u32 %s164_s8, 4  ;;  %s173_s9 = int_to_ptr.vmem [resolvable:$true] %s172_s9 }
  0x2d   : > { %s170_s12 = scalar_lea.hbm %s8013_s2, %s5799_s7  ;;  %s161_s18 = scalar_lea.sflag [#allocation5], %s6977_s23 }
  0x2e   : > { %s8019_s6 = scalar_select %p7022_p9, 1, 0 }
  0x2f   : > { %s6838_s19 = scalar_lea.hbm %s170_s12, 64  ;;  %s6843_s5 = scalar_lea.hbm %s8013_s2, 128 }
  0x30   : > { %p6839_p3 = scmp.ne.s32.totalorder %s170_s12, %s6838_s19  ;;  %p6844_p6 = scmp.lt.s32.totalorder %s170_s12, %s8013_s2 }
  0x31   : > { %p6845_p8 = scmp.lt.s32.totalorder %s6843_s5, %s6838_s19 }
  0x32   : > { %p6841_p4 = pnand %p6839_p3, %p6812_p12 }
  0x33   : > { %p6846_p11 = por %p6845_p8, %p6844_p6 }
  0x34   : > { %p6842_p5 = pneg %p6841_p4 }
  0x36   : > { %p6847_p13 = pnand %p6846_p11, %p6842_p5 }
  0x38   : > { %6850 = shalt.err (!%p6847_p13)
}
  0x39   : > { %s6851_s25 = scalar_lea.vmem %s173_s9, 64  ;;  %s6910_s23 = smov [#allocation4]  }
  0x3a   : > { %p6852_p1 = scmp.ne.s32.totalorder %s173_s9, %s6851_s25  ;;  %s6856_s27 = sshll.u32 %s6910_s23, 4  ;;  %s6857_s27 = int_to_ptr.vmem [resolvable:$false] %s6856_s27 }
  0x3b   : > { %s6858_s28 = scalar_lea.vmem %s6857_s27, 128  ;;  %p6859_p3 = scmp.lt.s32.totalorder %s173_s9, %s6857_s27 }
  0x3c   : > { %p6854_p0 = pnand %p6852_p1, %p6812_p12  ;;  %p6860_p4 = scmp.lt.s32.totalorder %s6858_s28, %s6851_s25 }
  0x3e   : > { %p6855_p2 = pneg %p6854_p0  ;;  %p6861_p7 = por %p6860_p4, %p6859_p3 }
  0x40   : > { %p6862_p9 = pnand %p6861_p7, %p6855_p2 }
  0x42   : > { %6865 = shalt.err (!%p6862_p9)
}
  0x43   : > { %5813 = dma.hbm_to_vmem [thread:$0]  (!%p6981_p10), %s170_s12, 64, %s173_s9, %s161_s18  }
  0x44   : > { %p8020_p5 = scmp.ne.s32.totalorder %s8019_s6, 0 }
  0x45   : > { %s7048_s30 = sand.u32 (!%p8020_p5), 1, %s6896_s13   ;;  %p8021_p12 = scmp.ne.s32.totalorder (!%p8020_p5), %s8016_s21, 0 }
  0x46   : > { %181 = sbr.rel (%p8020_p5) target bundleno = 932 (0x3a4), region = 32  ;;  %s184_s8 = scalar_lea.sflag (!%p8020_p5), [#allocation3], %s7048_s30 }
  0x47   : > { %s5802_s7 = smul.u32 (!%p8020_p5), 5120, %s7048_s30 }
  0x49   : > { %s7052_s10 = scalar_lea.vmem (!%p8020_p5), [#allocation2], %s5802_s7 }
  0x4b   : > { %6883 = dma.done.wait (%p8021_p12), %s184_s8, 81920  }
  0x4c   : > { %6885 = vsyncadd (%p8021_p12), %s184_s8, 4294885376  ;;  %s5151_s26 = sshll.u32 %s7048_s30, 2  ;;  %s193_s6 = scalar_lea.sflag [#allocation5], %s7048_s30 }
  0x4d   : > { %s7060_s9 = scalar_lea.vmem [#allocation4], %s5151_s26 }
  0x4e   : > { %6887 = dma.done.wait (%p8021_p12), %s193_s6, 64  }
  0x4f   : > { %6889 = vsyncadd (%p8021_p12), %s193_s6, 4294967232  ;;  %v5850_v0 = vld [vmem:[%s7052_s10 + $0xe4] ss:$16 sps:$4 sm:$0xff]   ;;  %v5854_v2 = vld [vmem:[%s7052_s10 + $0xe0] ss:$16 sps:$4 sm:$0xff]   ;;  %p8022_p7 = scmp.ne.s32.totalorder %s8017_s22, 0 }
  0x50   : > { %v5852_v1 = vld [vmem:[%s7052_s10 + $0x2e4] ss:$16 sps:$4 sm:$0xff]   ;;  %4148 = vmatprep.subr.bf16.mxu0 %v5850_v0  ;;  %v5855_v3 = vld [vmem:[%s7052_s10 + $0x2e0] ss:$16 sps:$4 sm:$0xff]   ;;  %v227_v46 = vld [vmem:[%s8011_s0 + $0x8] sm:$0xff] }
  0x51   : > { %4191 = vmatprep.subr.bf16.mxu1 %v5852_v1  ;;  %v5856_v4 = vld [vmem:[%s7052_s10 + $0xc4] ss:$16 sps:$4 sm:$0xff]   ;;  %4149 = vmatpush1.bf16.msra.mxu0 %v5854_v2  ;;  %v5860_v6 = vld [vmem:[%s7052_s10 + $0xc0] ss:$16 sps:$4 sm:$0xff]   ;;  %v247_v47 = vld [vmem:[%s8011_s0 + $0xa8] sm:$0xff] }
  0x52   : > { %4192 = vmatpush1.bf16.msra.mxu1 %v5855_v3  ;;  %v5858_v5 = vld [vmem:[%s7052_s10 + $0x2c4] ss:$16 sps:$4 sm:$0xff]   ;;  %4150 = vmatprep.subr.bf16.mxu0 %v5856_v4  ;;  %v5861_v7 = vld [vmem:[%s7052_s10 + $0x2c0] ss:$16 sps:$4 sm:$0xff]   ;;  %v229_v48 = vld [vmem:[%s8011_s0 + $0x18] sm:$0xff]  ;;  %v7127_v53 = vpack.c.bf16 %v247_v47, %v227_v46 }
  0x53   : > { %4193 = vmatprep.subr.bf16.mxu1 %v5858_v5  ;;  %v5862_v8 = vld [vmem:[%s7052_s10 + $0xa4] ss:$16 sps:$4 sm:$0xff]   ;;  %v5866_v10 = vld [vmem:[%s7052_s10 + $0xa0] ss:$16 sps:$4 sm:$0xff]   ;;  %v249_v49 = vld [vmem:[%s8011_s0 + $0xb8] sm:$0xff] }
  0x54   : > { %v5864_v9 = vld [vmem:[%s7052_s10 + $0x2a4] ss:$16 sps:$4 sm:$0xff]   ;;  %v5867_v11 = vld [vmem:[%s7052_s10 + $0x2a0] ss:$16 sps:$4 sm:$0xff]   ;;  %v7129_v54 = vpack.c.bf16 %v249_v49, %v229_v48  ;;  %4180 = vmatprep.mubr.bf16.mxu0 %v7127_v53  ;;  %v253_v46 = vld [vmem:[%s8011_s0 + $0xd8] sm:$0xff] }
  0x55   : > { %4151 = vmatpush1.bf16.msra.mxu0 %v5860_v6  ;;  %v5868_v12 = vld [vmem:[%s7052_s10 + $0x84] ss:$16 sps:$4 sm:$0xff]   ;;  %v5872_v14 = vld [vmem:[%s7052_s10 + $0x80] ss:$16 sps:$4 sm:$0xff]  }
  0x56   : > { %4194 = vmatpush1.bf16.msra.mxu1 %v5861_v7  ;;  %4152 = vmatprep.subr.bf16.mxu0 %v5862_v8  ;;  %v5870_v13 = vld [vmem:[%s7052_s10 + $0x284] ss:$16 sps:$4 sm:$0xff]   ;;  %v5873_v15 = vld [vmem:[%s7052_s10 + $0x280] ss:$16 sps:$4 sm:$0xff]  }
  0x57   : > { %4195 = vmatprep.subr.bf16.mxu1 %v5864_v9  ;;  %v5874_v16 = vld [vmem:[%s7052_s10 + $0x64] ss:$16 sps:$4 sm:$0xff]   ;;  %v5878_v18 = vld [vmem:[%s7052_s10 + $0x60] ss:$16 sps:$4 sm:$0xff]   ;;  %4223 = vmatprep.mubr.bf16.mxu1 %v7129_v54 }
  0x58   : > { %v5876_v17 = vld [vmem:[%s7052_s10 + $0x264] ss:$16 sps:$4 sm:$0xff]   ;;  %v5879_v19 = vld [vmem:[%s7052_s10 + $0x260] ss:$16 sps:$4 sm:$0xff]  }
  0x59   : > { %4153 = vmatpush1.bf16.msra.mxu0 %v5866_v10  ;;  %v5880_v20 = vld [vmem:[%s7052_s10 + $0x44] ss:$16 sps:$4 sm:$0xff]   ;;  %v5884_v22 = vld [vmem:[%s7052_s10 + $0x40] ss:$16 sps:$4 sm:$0xff]  }
  0x5a   : > { %4196 = vmatpush1.bf16.msra.mxu1 %v5867_v11  ;;  %4154 = vmatprep.subr.bf16.mxu0 %v5868_v12  ;;  %v5882_v21 = vld [vmem:[%s7052_s10 + $0x244] ss:$16 sps:$4 sm:$0xff]   ;;  %v5885_v23 = vld [vmem:[%s7052_s10 + $0x240] ss:$16 sps:$4 sm:$0xff]  }
  0x5b   : > { %4197 = vmatprep.subr.bf16.mxu1 %v5870_v13  ;;  %v5886_v24 = vld [vmem:[%s7052_s10 + $0x24] ss:$16 sps:$4 sm:$0xff]   ;;  %v5890_v26 = vld [vmem:[%s7052_s10 + $0x20] ss:$16 sps:$4 sm:$0xff]  }
  0x5c   : > { %v5888_v25 = vld [vmem:[%s7052_s10 + $0x224] ss:$16 sps:$4 sm:$0xff]   ;;  %v5891_v27 = vld [vmem:[%s7052_s10 + $0x220] ss:$16 sps:$4 sm:$0xff]  }
  0x5d   : > { %4155 = vmatpush1.bf16.msra.mxu0 %v5872_v14  ;;  %v5892_v28 = vld [vmem:[%s7052_s10 + $0x4] ss:$16 sps:$4 sm:$0xff]   ;;  %v5896_v30 = vld [vmem:[%s7052_s10] ss:$16 sps:$4 sm:$0xff]  }
  0x5e   : > { %4198 = vmatpush1.bf16.msra.mxu1 %v5873_v15  ;;  %4156 = vmatprep.subr.bf16.mxu0 %v5874_v16  ;;  %v5894_v29 = vld [vmem:[%s7052_s10 + $0x204] ss:$16 sps:$4 sm:$0xff]   ;;  %v5897_v31 = vld [vmem:[%s7052_s10 + $0x200] ss:$16 sps:$4 sm:$0xff]  }
  0x5f   : > { %4199 = vmatprep.subr.bf16.mxu1 %v5876_v17  ;;  %v5898_v32 = vld [vmem:[%s7052_s10 + $0x1e4] ss:$16 sps:$4 sm:$0xff]   ;;  %v5902_v34 = vld [vmem:[%s7052_s10 + $0x1e0] ss:$16 sps:$4 sm:$0xff]  }
  0x60   : > { %v5900_v33 = vld [vmem:[%s7052_s10 + $0x3e4] ss:$16 sps:$4 sm:$0xff]   ;;  %v5903_v35 = vld [vmem:[%s7052_s10 + $0x3e0] ss:$16 sps:$4 sm:$0xff]  }
  0x61   : > { %4157 = vmatpush1.bf16.msra.mxu0 %v5878_v18  ;;  %v5904_v36 = vld [vmem:[%s7052_s10 + $0x1c4] ss:$16 sps:$4 sm:$0xff]   ;;  %v5908_v38 = vld [vmem:[%s7052_s10 + $0x1c0] ss:$16 sps:$4 sm:$0xff]  }
  0x62   : > { %4200 = vmatpush1.bf16.msra.mxu1 %v5879_v19  ;;  %4158 = vmatprep.subr.bf16.mxu0 %v5880_v20  ;;  %v5906_v37 = vld [vmem:[%s7052_s10 + $0x3c4] ss:$16 sps:$4 sm:$0xff]   ;;  %v5909_v39 = vld [vmem:[%s7052_s10 + $0x3c0] ss:$16 sps:$4 sm:$0xff]  }
  0x63   : > { %4201 = vmatprep.subr.bf16.mxu1 %v5882_v21  ;;  %v5910_v40 = vld [vmem:[%s7052_s10 + $0x1a4] ss:$16 sps:$4 sm:$0xff]   ;;  %v5914_v42 = vld [vmem:[%s7052_s10 + $0x1a0] ss:$16 sps:$4 sm:$0xff]  }
  0x64   : > { %v5912_v41 = vld [vmem:[%s7052_s10 + $0x3a4] ss:$16 sps:$4 sm:$0xff]   ;;  %v5915_v43 = vld [vmem:[%s7052_s10 + $0x3a0] ss:$16 sps:$4 sm:$0xff]  }
  0x65   : > { %4159 = vmatpush1.bf16.msra.mxu0 %v5884_v22  ;;  %v5916_v44 = vld [vmem:[%s7052_s10 + $0x184] ss:$16 sps:$4 sm:$0xff]   ;;  %v5920_v50 = vld [vmem:[%s7052_s10 + $0x180] ss:$16 sps:$4 sm:$0xff]  }
  0x66   : > { %4202 = vmatpush1.bf16.msra.mxu1 %v5885_v23  ;;  %4160 = vmatprep.subr.bf16.mxu0 %v5886_v24  ;;  %v5918_v45 = vld [vmem:[%s7052_s10 + $0x384] ss:$16 sps:$4 sm:$0xff]   ;;  %v5921_v51 = vld [vmem:[%s7052_s10 + $0x380] ss:$16 sps:$4 sm:$0xff]  }
  0x67   : > { %4203 = vmatprep.subr.bf16.mxu1 %v5888_v25  ;;  %v5922_v52 = vld [vmem:[%s7052_s10 + $0x164] ss:$16 sps:$4 sm:$0xff]   ;;  %v5926_v56 = vld [vmem:[%s7052_s10 + $0x160] ss:$16 sps:$4 sm:$0xff]  }
  0x68   : > { %v5924_v55 = vld [vmem:[%s7052_s10 + $0x364] ss:$16 sps:$4 sm:$0xff]   ;;  %v5927_v57 = vld [vmem:[%s7052_s10 + $0x360] ss:$16 sps:$4 sm:$0xff]  }
  0x69   : > { %4161 = vmatpush1.bf16.msra.mxu0 %v5890_v26  ;;  %v5928_v58 = vld [vmem:[%s7052_s10 + $0x144] ss:$16 sps:$4 sm:$0xff]   ;;  %v5932_v60 = vld [vmem:[%s7052_s10 + $0x140] ss:$16 sps:$4 sm:$0xff]  }
  0x6a   : > { %4204 = vmatpush1.bf16.msra.mxu1 %v5891_v27  ;;  %4162 = vmatprep.subr.bf16.mxu0 %v5892_v28  ;;  %v5930_v59 = vld [vmem:[%s7052_s10 + $0x344] ss:$16 sps:$4 sm:$0xff]   ;;  %v5933_v61 = vld [vmem:[%s7052_s10 + $0x340] ss:$16 sps:$4 sm:$0xff]  }
  0x6b   : > { %4205 = vmatprep.subr.bf16.mxu1 %v5894_v29  ;;  %v5934_v62 = vld [vmem:[%s7052_s10 + $0x124] ss:$16 sps:$4 sm:$0xff]   ;;  %v5938_v0 = vld [vmem:[%s7052_s10 + $0x120] ss:$16 sps:$4 sm:$0xff]  }
  0x6c   : > { %v5936_v63 = vld [vmem:[%s7052_s10 + $0x324] ss:$16 sps:$4 sm:$0xff]   ;;  %v5939_v1 = vld [vmem:[%s7052_s10 + $0x320] ss:$16 sps:$4 sm:$0xff]  }
  0x6d   : > { %4163 = vmatpush1.bf16.msra.mxu0 %v5896_v30  ;;  %v5940_v2 = vld [vmem:[%s7052_s10 + $0x104] ss:$16 sps:$4 sm:$0xff]   ;;  %v5944_v4 = vld [vmem:[%s7052_s10 + $0x100] ss:$16 sps:$4 sm:$0xff]  }
  0x6e   : > { %4206 = vmatpush1.bf16.msra.mxu1 %v5897_v31  ;;  %4164 = vmatprep.subr.bf16.mxu0 %v5898_v32  ;;  %v5942_v3 = vld [vmem:[%s7052_s10 + $0x304] ss:$16 sps:$4 sm:$0xff]   ;;  %v5945_v5 = vld [vmem:[%s7052_s10 + $0x300] ss:$16 sps:$4 sm:$0xff]  }
  0x6f   : > { %4207 = vmatprep.subr.bf16.mxu1 %v5900_v33  ;;  %v226_v6 = vld [vmem:[%s8011_s0] sm:$0xff]  ;;  %v228_v8 = vld [vmem:[%s8011_s0 + $0x10] sm:$0xff] }
  0x70   : > { %v246_v7 = vld [vmem:[%s8011_s0 + $0xa0] sm:$0xff]  ;;  %v248_v9 = vld [vmem:[%s8011_s0 + $0xb0] sm:$0xff] }
  0x71   : > { %4165 = vmatpush2.bf16.msra.mxu0 %v5902_v34  ;;  %v5948_v10 = vld [vmem:[%s7052_s10 + $0x4e4] ss:$16 sps:$4 sm:$0xff]   ;;  %v7162_v12 = vpack.c.bf16 %v246_v7, %v226_v6  ;;  %v7164_v13 = vpack.c.bf16 %v248_v9, %v228_v8  ;;  %v5946_v14 = vld [vmem:[%s7052_s10 + $0x4e0] ss:$16 sps:$4 sm:$0xff]  }
  0x72   : > { %4208 = vmatpush2.bf16.msra.mxu1 %v5903_v35  ;;  %4166 = vmatprep.subr.bf16.mxu0 %v5904_v36  ;;  %v5951_v11 = vld [vmem:[%s7052_s10 + $0x6e4] ss:$16 sps:$4 sm:$0xff]   ;;  %v5949_v15 = vld [vmem:[%s7052_s10 + $0x6e0] ss:$16 sps:$4 sm:$0xff]  }
  0x73   : > { %4209 = vmatprep.subr.bf16.mxu1 %v5906_v37  ;;  %v5954_v16 = vld [vmem:[%s7052_s10 + $0x4c4] ss:$16 sps:$4 sm:$0xff]   ;;  %v5952_v18 = vld [vmem:[%s7052_s10 + $0x4c0] ss:$16 sps:$4 sm:$0xff]  }
  0x74   : > { %v5957_v17 = vld [vmem:[%s7052_s10 + $0x6c4] ss:$16 sps:$4 sm:$0xff]   ;;  %v5955_v19 = vld [vmem:[%s7052_s10 + $0x6c0] ss:$16 sps:$4 sm:$0xff]  }
  0x75   : > { %4167 = vmatpush2.bf16.msra.mxu0 %v5908_v38  ;;  %v5960_v20 = vld [vmem:[%s7052_s10 + $0x4a4] ss:$16 sps:$4 sm:$0xff]   ;;  %v5958_v22 = vld [vmem:[%s7052_s10 + $0x4a0] ss:$16 sps:$4 sm:$0xff]  }
  0x76   : > { %4210 = vmatpush2.bf16.msra.mxu1 %v5909_v39  ;;  %4168 = vmatprep.subr.bf16.mxu0 %v5910_v40  ;;  %v5963_v21 = vld [vmem:[%s7052_s10 + $0x6a4] ss:$16 sps:$4 sm:$0xff]   ;;  %v5961_v23 = vld [vmem:[%s7052_s10 + $0x6a0] ss:$16 sps:$4 sm:$0xff]   ;;  %v231_v40 = vld [vmem:[%s8011_s0 + $0x28] sm:$0xff] }
  0x77   : > { %4211 = vmatprep.subr.bf16.mxu1 %v5912_v41  ;;  %v5966_v24 = vld [vmem:[%s7052_s10 + $0x484] ss:$16 sps:$4 sm:$0xff]   ;;  %v5964_v26 = vld [vmem:[%s7052_s10 + $0x480] ss:$16 sps:$4 sm:$0xff]   ;;  %v251_v41 = vld [vmem:[%s8011_s0 + $0xc8] sm:$0xff] }
  0x78   : > { %v5969_v25 = vld [vmem:[%s7052_s10 + $0x684] ss:$16 sps:$4 sm:$0xff]   ;;  %v5967_v27 = vld [vmem:[%s7052_s10 + $0x680] ss:$16 sps:$4 sm:$0xff]  }
  0x79   : > { %4169 = vmatpush2.bf16.msra.mxu0 %v5914_v42  ;;  %v5972_v28 = vld [vmem:[%s7052_s10 + $0x464] ss:$16 sps:$4 sm:$0xff]   ;;  %v5970_v30 = vld [vmem:[%s7052_s10 + $0x460] ss:$16 sps:$4 sm:$0xff]   ;;  %v233_v42 = vld [vmem:[%s8011_s0 + $0x38] sm:$0xff] }
  0x7a   : > { %4212 = vmatpush2.bf16.msra.mxu1 %v5915_v43  ;;  %4170 = vmatprep.subr.bf16.mxu0 %v5916_v44  ;;  %v5975_v29 = vld [vmem:[%s7052_s10 + $0x664] ss:$16 sps:$4 sm:$0xff]   ;;  %v5973_v31 = vld [vmem:[%s7052_s10 + $0x660] ss:$16 sps:$4 sm:$0xff]   ;;  %v7210_v47 = vpack.c.bf16 %v253_v46, %v233_v42  ;;  %v257_v42 = vld [vmem:[%s8011_s0 + $0xf8] sm:$0xff] }
  0x7b   : > { %4213 = vmatprep.subr.bf16.mxu1 %v5918_v45  ;;  %v5978_v32 = vld [vmem:[%s7052_s10 + $0x444] ss:$16 sps:$4 sm:$0xff]   ;;  %v5976_v34 = vld [vmem:[%s7052_s10 + $0x440] ss:$16 sps:$4 sm:$0xff]   ;;  %v7205_v45 = vpack.c.bf16 %v251_v41, %v231_v40  ;;  %v237_v41 = vld [vmem:[%s8011_s0 + $0x58] sm:$0xff] }
  0x7c   : > { %v5981_v33 = vld [vmem:[%s7052_s10 + $0x644] ss:$16 sps:$4 sm:$0xff]   ;;  %v5979_v35 = vld [vmem:[%s7052_s10 + $0x640] ss:$16 sps:$4 sm:$0xff]   ;;  %v7292_v46 = vpack.c.bf16 %v257_v42, %v237_v41 }
  0x7d   : > { %4171 = vmatpush2.bf16.msra.mxu0 %v5920_v50  ;;  %v5984_v36 = vld [vmem:[%s7052_s10 + $0x424] ss:$16 sps:$4 sm:$0xff]   ;;  %v5982_v38 = vld [vmem:[%s7052_s10 + $0x420] ss:$16 sps:$4 sm:$0xff]  }
  0x7e   : > { %4214 = vmatpush2.bf16.msra.mxu1 %v5921_v51  ;;  %4172 = vmatprep.subr.bf16.mxu0 %v5922_v52  ;;  %v5987_v37 = vld [vmem:[%s7052_s10 + $0x624] ss:$16 sps:$4 sm:$0xff]   ;;  %v5985_v39 = vld [vmem:[%s7052_s10 + $0x620] ss:$16 sps:$4 sm:$0xff]  }
  0x7f   : > { %4215 = vmatprep.subr.bf16.mxu1 %v5924_v55  ;;  %v5990_v43 = vld [vmem:[%s7052_s10 + $0x404] ss:$16 sps:$4 sm:$0xff]   ;;  %v5988_v48 = vld [vmem:[%s7052_s10 + $0x400] ss:$16 sps:$4 sm:$0xff]  }
  0x80   : > { %v5993_v44 = vld [vmem:[%s7052_s10 + $0x604] ss:$16 sps:$4 sm:$0xff]   ;;  %v5991_v49 = vld [vmem:[%s7052_s10 + $0x600] ss:$16 sps:$4 sm:$0xff]  }
  0x81   : > { %4173 = vmatpush2.bf16.msra.mxu0 %v5926_v56  ;;  %v5996_v50 = vld [vmem:[%s7052_s10 + $0x5e4] ss:$16 sps:$4 sm:$0xff]   ;;  %v5994_v52 = vld [vmem:[%s7052_s10 + $0x5e0] ss:$16 sps:$4 sm:$0xff]  }
  0x82   : > { %4216 = vmatpush2.bf16.msra.mxu1 %v5927_v57  ;;  %4174 = vmatprep.subr.bf16.mxu0 %v5928_v58  ;;  %v5999_v51 = vld [vmem:[%s7052_s10 + $0x7e4] ss:$16 sps:$4 sm:$0xff]   ;;  %v5997_v55 = vld [vmem:[%s7052_s10 + $0x7e0] ss:$16 sps:$4 sm:$0xff]  }
  0x83   : > { %4217 = vmatprep.subr.bf16.mxu1 %v5930_v59  ;;  %v6002_v56 = vld [vmem:[%s7052_s10 + $0x5c4] ss:$16 sps:$4 sm:$0xff]   ;;  %v6000_v58 = vld [vmem:[%s7052_s10 + $0x5c0] ss:$16 sps:$4 sm:$0xff]  }
  0x84   : > { %v6005_v57 = vld [vmem:[%s7052_s10 + $0x7c4] ss:$16 sps:$4 sm:$0xff]   ;;  %v6003_v59 = vld [vmem:[%s7052_s10 + $0x7c0] ss:$16 sps:$4 sm:$0xff]  }
  0x85   : > { %4175 = vmatpush2.bf16.msra.mxu0 %v5932_v60  ;;  %v6008_v60 = vld [vmem:[%s7052_s10 + $0x5a4] ss:$16 sps:$4 sm:$0xff]   ;;  %v6018_v6 = vld [vmem:[%s7052_s10 + $0x560] ss:$16 sps:$4 sm:$0xff]  }
  0x86   : > { %4218 = vmatpush2.bf16.msra.mxu1 %v5933_v61  ;;  %4176 = vmatprep.subr.bf16.mxu0 %v5934_v62  ;;  %v6011_v61 = vld [vmem:[%s7052_s10 + $0x7a4] ss:$16 sps:$4 sm:$0xff]   ;;  %v6006_v62 = vld [vmem:[%s7052_s10 + $0x5a0] ss:$16 sps:$4 sm:$0xff]  }
  0x87   : > { %4219 = vmatprep.subr.bf16.mxu1 %v5936_v63  ;;  %v6009_v63 = vld [vmem:[%s7052_s10 + $0x7a0] ss:$16 sps:$4 sm:$0xff]   ;;  %v6026_v8 = vld [vmem:[%s7052_s10 + $0x544] ss:$16 sps:$4 sm:$0xff]  }
  0x88   : > { %v6021_v7 = vld [vmem:[%s7052_s10 + $0x760] ss:$16 sps:$4 sm:$0xff]   ;;  %v6029_v9 = vld [vmem:[%s7052_s10 + $0x744] ss:$16 sps:$4 sm:$0xff]  }
  0x89   : > { %4177 = vmatpush2.bf16.msra.mxu0 %v5938_v0  ;;  %v6014_v0 = vld [vmem:[%s7052_s10 + $0x584] ss:$16 sps:$4 sm:$0xff]   ;;  %v6132_v41 = vld [vmem:[%s7052_s10 + $0x900] ss:$16 sps:$4 sm:$0xff]  }
  0x8a   : > { %4220 = vmatpush2.bf16.msra.mxu1 %v5939_v1  ;;  %4178 = vmatprep.subr.bf16.mxu0 %v5940_v2  ;;  %v6017_v1 = vld [vmem:[%s7052_s10 + $0x784] ss:$16 sps:$4 sm:$0xff]   ;;  %v6012_v2 = vld [vmem:[%s7052_s10 + $0x580] ss:$16 sps:$4 sm:$0xff]  }
  0x8b   : > { %4221 = vmatprep.subr.bf16.mxu1 %v5942_v3  ;;  %v6015_v3 = vld [vmem:[%s7052_s10 + $0x780] ss:$16 sps:$4 sm:$0xff]  }
  0x8c   : > { %v6135_v42 = vld [vmem:[%s7052_s10 + $0xb00] ss:$16 sps:$4 sm:$0xff]  }
  0x8d   : > { %4179 = vmatpush2.bf16.msra.mxu0 %v5944_v4  ;;  %v6020_v4 = vld [vmem:[%s7052_s10 + $0x564] ss:$16 sps:$4 sm:$0xff]  }
  0x8e   : > { %4222 = vmatpush2.bf16.msra.mxu1 %v5945_v5  ;;  %4234 = vmatprep.subr.bf16.mxu0 %v5948_v10  ;;  %v6023_v5 = vld [vmem:[%s7052_s10 + $0x764] ss:$16 sps:$4 sm:$0xff]   ;;  %v6024_v10 = vld [vmem:[%s7052_s10 + $0x540] ss:$16 sps:$4 sm:$0xff]  }
  0x8f   : > { %4277 = vmatprep.subr.bf16.mxu1 %v5951_v11  ;;  %v6027_v11 = vld [vmem:[%s7052_s10 + $0x740] ss:$16 sps:$4 sm:$0xff]  }
  0x90   : > { %4181 = vmatmul.mubr.bf16.vlgmr.msra.gmra.mxu0 %v7162_v12 }
  0x91   : > { %4224 = vmatmul.mubr.bf16.vlgmr.msra.gmra.mxu1 %v7164_v13  ;;  %4235 = vmatpush1.bf16.msra.mxu0 %v5946_v14  ;;  %v6032_v14 = vld [vmem:[%s7052_s10 + $0x524] ss:$16 sps:$4 sm:$0xff]  }
  0x92   : > { %4278 = vmatpush1.bf16.msra.mxu1 %v5949_v15  ;;  %4236 = vmatprep.subr.bf16.mxu0 %v5954_v16  ;;  %v6035_v15 = vld [vmem:[%s7052_s10 + $0x724] ss:$16 sps:$4 sm:$0xff]   ;;  %v6030_v16 = vld [vmem:[%s7052_s10 + $0x520] ss:$16 sps:$4 sm:$0xff]  }
  0x93   : > { %4279 = vmatprep.subr.bf16.mxu1 %v5957_v17  ;;  %4266 = vmatprep.mubr.bf16.mxu0 %v7205_v45  ;;  %v6033_v17 = vld [vmem:[%s7052_s10 + $0x720] ss:$16 sps:$4 sm:$0xff]  }
  0x94   : > { %4309 = vmatprep.mubr.bf16.mxu1 %v7210_v47 }
  0x95   : > { %4237 = vmatpush1.bf16.msra.mxu0 %v5952_v18  ;;  %v6038_v18 = vld [vmem:[%s7052_s10 + $0x504] ss:$16 sps:$4 sm:$0xff]  }
  0x96   : > { %4280 = vmatpush1.bf16.msra.mxu1 %v5955_v19  ;;  %4238 = vmatprep.subr.bf16.mxu0 %v5960_v20  ;;  %v6041_v19 = vld [vmem:[%s7052_s10 + $0x704] ss:$16 sps:$4 sm:$0xff]   ;;  %v6036_v20 = vld [vmem:[%s7052_s10 + $0x500] ss:$16 sps:$4 sm:$0xff]  }
  0x97   : > { %4281 = vmatprep.subr.bf16.mxu1 %v5963_v21  ;;  %v6039_v21 = vld [vmem:[%s7052_s10 + $0x700] ss:$16 sps:$4 sm:$0xff]  }
  0x99   : > { %4239 = vmatpush1.bf16.msra.mxu0 %v5958_v22  ;;  %v230_v22 = vld [vmem:[%s8011_s0 + $0x20] sm:$0xff] }
  0x9a   : > { %4282 = vmatpush1.bf16.msra.mxu1 %v5961_v23  ;;  %4240 = vmatprep.subr.bf16.mxu0 %v5966_v24  ;;  %v250_v23 = vld [vmem:[%s8011_s0 + $0xc0] sm:$0xff]  ;;  %v232_v24 = vld [vmem:[%s8011_s0 + $0x30] sm:$0xff] }
  0x9b   : > { %4283 = vmatprep.subr.bf16.mxu1 %v5969_v25  ;;  %v252_v25 = vld [vmem:[%s8011_s0 + $0xd0] sm:$0xff] }
  0x9d   : > { %4241 = vmatpush1.bf16.msra.mxu0 %v5964_v26  ;;  %v6044_v26 = vld [vmem:[%s7052_s10 + $0x8e4] ss:$16 sps:$4 sm:$0xff]  }
  0x9e   : > { %4284 = vmatpush1.bf16.msra.mxu1 %v5967_v27  ;;  %4242 = vmatprep.subr.bf16.mxu0 %v5972_v28  ;;  %v6047_v27 = vld [vmem:[%s7052_s10 + $0xae4] ss:$16 sps:$4 sm:$0xff]   ;;  %v7262_v28 = vpack.c.bf16 %v250_v23, %v230_v22  ;;  %v6108_v22 = vld [vmem:[%s7052_s10 + $0x980] ss:$16 sps:$4 sm:$0xff]  }
  0x9f   : > { %4285 = vmatprep.subr.bf16.mxu1 %v5975_v29  ;;  %v7264_v29 = vpack.c.bf16 %v252_v25, %v232_v24  ;;  %v6111_v23 = vld [vmem:[%s7052_s10 + $0xb80] ss:$16 sps:$4 sm:$0xff]   ;;  %v6116_v24 = vld [vmem:[%s7052_s10 + $0x964] ss:$16 sps:$4 sm:$0xff]  }
  0xa0   : > { %v6119_v25 = vld [vmem:[%s7052_s10 + $0xb64] ss:$16 sps:$4 sm:$0xff]  }
  0xa1   : > { %4243 = vmatpush1.bf16.msra.mxu0 %v5970_v30  ;;  %v6042_v30 = vld [vmem:[%s7052_s10 + $0x8e0] ss:$16 sps:$4 sm:$0xff]  }
  0xa2   : > { %4286 = vmatpush1.bf16.msra.mxu1 %v5973_v31  ;;  %4244 = vmatprep.subr.bf16.mxu0 %v5978_v32  ;;  %v6045_v31 = vld [vmem:[%s7052_s10 + $0xae0] ss:$16 sps:$4 sm:$0xff]   ;;  %v6050_v32 = vld [vmem:[%s7052_s10 + $0x8c4] ss:$16 sps:$4 sm:$0xff]  }
  0xa3   : > { %4287 = vmatprep.subr.bf16.mxu1 %v5981_v33  ;;  %v6053_v33 = vld [vmem:[%s7052_s10 + $0xac4] ss:$16 sps:$4 sm:$0xff]  }
  0xa5   : > { %4245 = vmatpush1.bf16.msra.mxu0 %v5976_v34  ;;  %v6048_v34 = vld [vmem:[%s7052_s10 + $0x8c0] ss:$16 sps:$4 sm:$0xff]  }
  0xa6   : > { %4288 = vmatpush1.bf16.msra.mxu1 %v5979_v35  ;;  %4246 = vmatprep.subr.bf16.mxu0 %v5984_v36  ;;  %v6051_v35 = vld [vmem:[%s7052_s10 + $0xac0] ss:$16 sps:$4 sm:$0xff]   ;;  %v6056_v36 = vld [vmem:[%s7052_s10 + $0x8a4] ss:$16 sps:$4 sm:$0xff]  }
  0xa7   : > { %4289 = vmatprep.subr.bf16.mxu1 %v5987_v37  ;;  %v6059_v37 = vld [vmem:[%s7052_s10 + $0xaa4] ss:$16 sps:$4 sm:$0xff]  }
  0xa9   : > { %4247 = vmatpush1.bf16.msra.mxu0 %v5982_v38  ;;  %v235_v38 = vld [vmem:[%s8011_s0 + $0x48] sm:$0xff] }
  0xaa   : > { %4290 = vmatpush1.bf16.msra.mxu1 %v5985_v39  ;;  %4248 = vmatprep.subr.bf16.mxu0 %v5990_v43  ;;  %v255_v39 = vld [vmem:[%s8011_s0 + $0xe8] sm:$0xff]  ;;  %v6054_v43 = vld [vmem:[%s7052_s10 + $0x8a0] ss:$16 sps:$4 sm:$0xff]  }
  0xab   : > { %4291 = vmatprep.subr.bf16.mxu1 %v5993_v44  ;;  %v7282_v40 = vpack.c.bf16 %v255_v39, %v235_v38  ;;  %v6057_v44 = vld [vmem:[%s7052_s10 + $0xaa0] ss:$16 sps:$4 sm:$0xff]   ;;  %v6134_v38 = vld [vmem:[%s7052_s10 + $0x904] ss:$16 sps:$4 sm:$0xff]  }
  0xac   : > { %v6137_v39 = vld [vmem:[%s7052_s10 + $0xb04] ss:$16 sps:$4 sm:$0xff]  }
  0xad   : > { %4249 = vmatpush1.bf16.msra.mxu0 %v5988_v48  ;;  %v6062_v48 = vld [vmem:[%s7052_s10 + $0x884] ss:$16 sps:$4 sm:$0xff]  }
  0xae   : > { %4292 = vmatpush1.bf16.msra.mxu1 %v5991_v49  ;;  %4250 = vmatprep.subr.bf16.mxu0 %v5996_v50  ;;  %v6065_v49 = vld [vmem:[%s7052_s10 + $0xa84] ss:$16 sps:$4 sm:$0xff]   ;;  %v6060_v50 = vld [vmem:[%s7052_s10 + $0x880] ss:$16 sps:$4 sm:$0xff]  }
  0xaf   : > { %4293 = vmatprep.subr.bf16.mxu1 %v5999_v51  ;;  %v6063_v51 = vld [vmem:[%s7052_s10 + $0xa80] ss:$16 sps:$4 sm:$0xff]  }
  0xb1   : > { %4251 = vmatpush2.bf16.msra.mxu0 %v5994_v52  ;;  %v6068_v52 = vld [vmem:[%s7052_s10 + $0x864] ss:$16 sps:$4 sm:$0xff]  }
  0xb2   : > { %4294 = vmatpush2.bf16.msra.mxu1 %v5997_v55  ;;  %4252 = vmatprep.subr.bf16.mxu0 %v6002_v56  ;;  %v6071_v55 = vld [vmem:[%s7052_s10 + $0xa64] ss:$16 sps:$4 sm:$0xff]   ;;  %v6066_v56 = vld [vmem:[%s7052_s10 + $0x860] ss:$16 sps:$4 sm:$0xff]  }
  0xb3   : > { %4295 = vmatprep.subr.bf16.mxu1 %v6005_v57  ;;  %v6069_v57 = vld [vmem:[%s7052_s10 + $0xa60] ss:$16 sps:$4 sm:$0xff]  }
  0xb5   : > { %4253 = vmatpush2.bf16.msra.mxu0 %v6000_v58  ;;  %v6074_v58 = vld [vmem:[%s7052_s10 + $0x844] ss:$16 sps:$4 sm:$0xff]  }
  0xb6   : > { %4296 = vmatpush2.bf16.msra.mxu1 %v6003_v59  ;;  %4254 = vmatprep.subr.bf16.mxu0 %v6008_v60  ;;  %v6077_v59 = vld [vmem:[%s7052_s10 + $0xa44] ss:$16 sps:$4 sm:$0xff]   ;;  %v6072_v60 = vld [vmem:[%s7052_s10 + $0x840] ss:$16 sps:$4 sm:$0xff]  }
  0xb7   : > { %4297 = vmatprep.subr.bf16.mxu1 %v6011_v61  ;;  %v6075_v61 = vld [vmem:[%s7052_s10 + $0xa40] ss:$16 sps:$4 sm:$0xff]  }
  0xb9   : > { %4255 = vmatpush2.bf16.msra.mxu0 %v6006_v62  ;;  %v6080_v62 = vld [vmem:[%s7052_s10 + $0x824] ss:$16 sps:$4 sm:$0xff]  }
  0xba   : > { %4298 = vmatpush2.bf16.msra.mxu1 %v6009_v63  ;;  %4256 = vmatprep.subr.bf16.mxu0 %v6014_v0  ;;  %v6083_v63 = vld [vmem:[%s7052_s10 + $0xa24] ss:$16 sps:$4 sm:$0xff]   ;;  %v6078_v0 = vld [vmem:[%s7052_s10 + $0x820] ss:$16 sps:$4 sm:$0xff]  }
  0xbb   : > { %4299 = vmatprep.subr.bf16.mxu1 %v6017_v1  ;;  %v6081_v1 = vld [vmem:[%s7052_s10 + $0xa20] ss:$16 sps:$4 sm:$0xff]  }
  0xbd   : > { %4257 = vmatpush2.bf16.msra.mxu0 %v6012_v2  ;;  %v6086_v2 = vld [vmem:[%s7052_s10 + $0x804] ss:$16 sps:$4 sm:$0xff]  }
  0xbe   : > { %4300 = vmatpush2.bf16.msra.mxu1 %v6015_v3  ;;  %4258 = vmatprep.subr.bf16.mxu0 %v6020_v4  ;;  %v6089_v3 = vld [vmem:[%s7052_s10 + $0xa04] ss:$16 sps:$4 sm:$0xff]   ;;  %v6084_v4 = vld [vmem:[%s7052_s10 + $0x800] ss:$16 sps:$4 sm:$0xff]  }
  0xbf   : > { %4301 = vmatprep.subr.bf16.mxu1 %v6023_v5  ;;  %v6087_v5 = vld [vmem:[%s7052_s10 + $0xa00] ss:$16 sps:$4 sm:$0xff]  }
  0xc1   : > { %4259 = vmatpush2.bf16.msra.mxu0 %v6018_v6  ;;  %v6092_v6 = vld [vmem:[%s7052_s10 + $0x9e4] ss:$16 sps:$4 sm:$0xff]  }
  0xc2   : > { %4302 = vmatpush2.bf16.msra.mxu1 %v6021_v7  ;;  %4260 = vmatprep.subr.bf16.mxu0 %v6026_v8  ;;  %v6095_v7 = vld [vmem:[%s7052_s10 + $0xbe4] ss:$16 sps:$4 sm:$0xff]   ;;  %v6090_v8 = vld [vmem:[%s7052_s10 + $0x9e0] ss:$16 sps:$4 sm:$0xff]  }
  0xc3   : > { %4303 = vmatprep.subr.bf16.mxu1 %v6029_v9  ;;  %v6093_v9 = vld [vmem:[%s7052_s10 + $0xbe0] ss:$16 sps:$4 sm:$0xff]  }
  0xc5   : > { %4261 = vmatpush2.bf16.msra.mxu0 %v6024_v10  ;;  %v6098_v10 = vld [vmem:[%s7052_s10 + $0x9c4] ss:$16 sps:$4 sm:$0xff]  }
  0xc6   : > { %4304 = vmatpush2.bf16.msra.mxu1 %v6027_v11  ;;  %4262 = vmatprep.subr.bf16.mxu0 %v6032_v14  ;;  %v6101_v11 = vld [vmem:[%s7052_s10 + $0xbc4] ss:$16 sps:$4 sm:$0xff]   ;;  %v6096_v14 = vld [vmem:[%s7052_s10 + $0x9c0] ss:$16 sps:$4 sm:$0xff]  }
  0xc7   : > { %4305 = vmatprep.subr.bf16.mxu1 %v6035_v15  ;;  %v6099_v15 = vld [vmem:[%s7052_s10 + $0xbc0] ss:$16 sps:$4 sm:$0xff]  }
  0xc9   : > { %4263 = vmatpush2.bf16.msra.mxu0 %v6030_v16  ;;  %v6104_v16 = vld [vmem:[%s7052_s10 + $0x9a4] ss:$16 sps:$4 sm:$0xff]  }
  0xca   : > { %4306 = vmatpush2.bf16.msra.mxu1 %v6033_v17  ;;  %4264 = vmatprep.subr.bf16.mxu0 %v6038_v18  ;;  %v6107_v17 = vld [vmem:[%s7052_s10 + $0xba4] ss:$16 sps:$4 sm:$0xff]   ;;  %v6102_v18 = vld [vmem:[%s7052_s10 + $0x9a0] ss:$16 sps:$4 sm:$0xff]  }
  0xcb   : > { %4307 = vmatprep.subr.bf16.mxu1 %v6041_v19  ;;  %v6105_v19 = vld [vmem:[%s7052_s10 + $0xba0] ss:$16 sps:$4 sm:$0xff]  }
  0xcd   : > { %4265 = vmatpush2.bf16.msra.mxu0 %v6036_v20  ;;  %v6110_v20 = vld [vmem:[%s7052_s10 + $0x984] ss:$16 sps:$4 sm:$0xff]  }
  0xce   : > { %4308 = vmatpush2.bf16.msra.mxu1 %v6039_v21  ;;  %4320 = vmatprep.subr.bf16.mxu0 %v6044_v26  ;;  %v6113_v21 = vld [vmem:[%s7052_s10 + $0xb84] ss:$16 sps:$4 sm:$0xff]   ;;  %v6114_v26 = vld [vmem:[%s7052_s10 + $0x960] ss:$16 sps:$4 sm:$0xff]  }
  0xcf   : > { %4363 = vmatprep.subr.bf16.mxu1 %v6047_v27  ;;  %v6117_v27 = vld [vmem:[%s7052_s10 + $0xb60] ss:$16 sps:$4 sm:$0xff]  }
  0xd0   : > { %4267 = vmatmul.mubr.bf16.vlgmr.msra.gmra.mxu0 %v7262_v28 }
  0xd1   : > { %4310 = vmatmul.mubr.bf16.vlgmr.msra.gmra.mxu1 %v7264_v29  ;;  %4321 = vmatpush1.bf16.msra.mxu0 %v6042_v30  ;;  %v6122_v30 = vld [vmem:[%s7052_s10 + $0x944] ss:$16 sps:$4 sm:$0xff]  }
  0xd2   : > { %4364 = vmatpush1.bf16.msra.mxu1 %v6045_v31  ;;  %4322 = vmatprep.subr.bf16.mxu0 %v6050_v32  ;;  %v6125_v31 = vld [vmem:[%s7052_s10 + $0xb44] ss:$16 sps:$4 sm:$0xff]   ;;  %v6120_v32 = vld [vmem:[%s7052_s10 + $0x940] ss:$16 sps:$4 sm:$0xff]  }
  0xd3   : > { %4365 = vmatprep.subr.bf16.mxu1 %v6053_v33  ;;  %4352 = vmatprep.mubr.bf16.mxu0 %v7282_v40  ;;  %v6123_v33 = vld [vmem:[%s7052_s10 + $0xb40] ss:$16 sps:$4 sm:$0xff]  }
  0xd4   : > { %4395 = vmatprep.mubr.bf16.mxu1 %v7292_v46 }
  0xd5   : > { %4323 = vmatpush1.bf16.msra.mxu0 %v6048_v34  ;;  %v6128_v34 = vld [vmem:[%s7052_s10 + $0x924] ss:$16 sps:$4 sm:$0xff]  }
  0xd6   : > { %4366 = vmatpush1.bf16.msra.mxu1 %v6051_v35  ;;  %4324 = vmatprep.subr.bf16.mxu0 %v6056_v36  ;;  %v6131_v35 = vld [vmem:[%s7052_s10 + $0xb24] ss:$16 sps:$4 sm:$0xff]   ;;  %v6126_v36 = vld [vmem:[%s7052_s10 + $0x920] ss:$16 sps:$4 sm:$0xff]  }
  0xd7   : > { %4367 = vmatprep.subr.bf16.mxu1 %v6059_v37  ;;  %v6129_v37 = vld [vmem:[%s7052_s10 + $0xb20] ss:$16 sps:$4 sm:$0xff]  }
  0xd9   : > { %4325 = vmatpush1.bf16.msra.mxu0 %v6054_v43  ;;  %v234_v43 = vld [vmem:[%s8011_s0 + $0x40] sm:$0xff] }
  0xda   : > { %4368 = vmatpush1.bf16.msra.mxu1 %v6057_v44  ;;  %4326 = vmatprep.subr.bf16.mxu0 %v6062_v48  ;;  %v254_v44 = vld [vmem:[%s8011_s0 + $0xe0] sm:$0xff]  ;;  %v236_v48 = vld [vmem:[%s8011_s0 + $0x50] sm:$0xff] }
  0xdb   : > { %4369 = vmatprep.subr.bf16.mxu1 %v6065_v49  ;;  %v256_v49 = vld [vmem:[%s8011_s0 + $0xf0] sm:$0xff] }
  0xdd   : > { %4327 = vmatpush1.bf16.msra.mxu0 %v6060_v50  ;;  %v6140_v50 = vld [vmem:[%s7052_s10 + $0xce4] ss:$16 sps:$4 sm:$0xff]  }
  0xde   : > { %4370 = vmatpush1.bf16.msra.mxu1 %v6063_v51  ;;  %4328 = vmatprep.subr.bf16.mxu0 %v6068_v52  ;;  %v6143_v51 = vld [vmem:[%s7052_s10 + $0xee4] ss:$16 sps:$4 sm:$0xff]   ;;  %v239_v52 = vld [vmem:[%s8011_s0 + $0x68] sm:$0xff] }
  0xdf   : > { %4371 = vmatprep.subr.bf16.mxu1 %v6071_v55  ;;  %v6138_v55 = vld [vmem:[%s7052_s10 + $0xce0] ss:$16 sps:$4 sm:$0xff]  }
  0xe1   : > { %4329 = vmatpush1.bf16.msra.mxu0 %v6066_v56  ;;  %v259_v56 = vld [vmem:[%s8011_s0 + $0x108] sm:$0xff] }
  0xe2   : > { %4372 = vmatpush1.bf16.msra.mxu1 %v6069_v57  ;;  %4330 = vmatprep.subr.bf16.mxu0 %v6074_v58  ;;  %v241_v57 = vld [vmem:[%s8011_s0 + $0x78] sm:$0xff]  ;;  %v7372_v58 = vpack.c.bf16 %v254_v44, %v234_v43  ;;  %v6198_v43 = vld [vmem:[%s7052_s10 + $0xda0] ss:$16 sps:$4 sm:$0xff]  }
  0xe3   : > { %4373 = vmatprep.subr.bf16.mxu1 %v6077_v59  ;;  %v7374_v59 = vpack.c.bf16 %v256_v49, %v236_v48  ;;  %v6201_v44 = vld [vmem:[%s7052_s10 + $0xfa0] ss:$16 sps:$4 sm:$0xff]   ;;  %v6206_v48 = vld [vmem:[%s7052_s10 + $0xd84] ss:$16 sps:$4 sm:$0xff]  }
  0xe4   : > { %v6209_v49 = vld [vmem:[%s7052_s10 + $0xf84] ss:$16 sps:$4 sm:$0xff]  }
  0xe5   : > { %4331 = vmatpush1.bf16.msra.mxu0 %v6072_v60  ;;  %v261_v60 = vld [vmem:[%s8011_s0 + $0x118] sm:$0xff] }
  0xe6   : > { %4374 = vmatpush1.bf16.msra.mxu1 %v6075_v61  ;;  %4332 = vmatprep.subr.bf16.mxu0 %v6080_v62  ;;  %v6141_v61 = vld [vmem:[%s7052_s10 + $0xee0] ss:$16 sps:$4 sm:$0xff]   ;;  %v6146_v62 = vld [vmem:[%s7052_s10 + $0xcc4] ss:$16 sps:$4 sm:$0xff]  }
  0xe7   : > { %4375 = vmatprep.subr.bf16.mxu1 %v6083_v63  ;;  %v6149_v63 = vld [vmem:[%s7052_s10 + $0xec4] ss:$16 sps:$4 sm:$0xff]  }
  0xe9   : > { %4333 = vmatpush1.bf16.msra.mxu0 %v6078_v0  ;;  %v7382_v0 = vpack.c.bf16 %v259_v56, %v239_v52  ;;  %v6212_v52 = vld [vmem:[%s7052_s10 + $0xd64] ss:$16 sps:$4 sm:$0xff]   ;;  %v6210_v56 = vld [vmem:[%s7052_s10 + $0xd60] ss:$16 sps:$4 sm:$0xff]  }
  0xea   : > { %4376 = vmatpush1.bf16.msra.mxu1 %v6081_v1  ;;  %4334 = vmatprep.subr.bf16.mxu0 %v6086_v2  ;;  %v7384_v1 = vpack.c.bf16 %v261_v60, %v241_v57  ;;  %v6144_v2 = vld [vmem:[%s7052_s10 + $0xcc0] ss:$16 sps:$4 sm:$0xff]   ;;  %v6218_v60 = vld [vmem:[%s7052_s10 + $0xd44] ss:$16 sps:$4 sm:$0xff]  }
  0xeb   : > { %4377 = vmatprep.subr.bf16.mxu1 %v6089_v3  ;;  %v6147_v3 = vld [vmem:[%s7052_s10 + $0xec0] ss:$16 sps:$4 sm:$0xff]  }
  0xec   : > { %v6213_v57 = vld [vmem:[%s7052_s10 + $0xf60] ss:$16 sps:$4 sm:$0xff]  }
  0xed   : > { %4335 = vmatpush1.bf16.msra.mxu0 %v6084_v4  ;;  %v6152_v4 = vld [vmem:[%s7052_s10 + $0xca4] ss:$16 sps:$4 sm:$0xff]  }
  0xee   : > { %4378 = vmatpush1.bf16.msra.mxu1 %v6087_v5  ;;  %4336 = vmatprep.subr.bf16.mxu0 %v6092_v6  ;;  %v6155_v5 = vld [vmem:[%s7052_s10 + $0xea4] ss:$16 sps:$4 sm:$0xff]   ;;  %v6150_v6 = vld [vmem:[%s7052_s10 + $0xca0] ss:$16 sps:$4 sm:$0xff]  }
  0xef   : > { %4379 = vmatprep.subr.bf16.mxu1 %v6095_v7  ;;  %v6153_v7 = vld [vmem:[%s7052_s10 + $0xea0] ss:$16 sps:$4 sm:$0xff]  }
  0xf1   : > { %4337 = vmatpush2.bf16.msra.mxu0 %v6090_v8  ;;  %v6158_v8 = vld [vmem:[%s7052_s10 + $0xc84] ss:$16 sps:$4 sm:$0xff]  }
  0xf2   : > { %4380 = vmatpush2.bf16.msra.mxu1 %v6093_v9  ;;  %4338 = vmatprep.subr.bf16.mxu0 %v6098_v10  ;;  %v6161_v9 = vld [vmem:[%s7052_s10 + $0xe84] ss:$16 sps:$4 sm:$0xff]   ;;  %v6156_v10 = vld [vmem:[%s7052_s10 + $0xc80] ss:$16 sps:$4 sm:$0xff]  }
  0xf3   : > { %4381 = vmatprep.subr.bf16.mxu1 %v6101_v11  ;;  %v6159_v11 = vld [vmem:[%s7052_s10 + $0xe80] ss:$16 sps:$4 sm:$0xff]  }
  0xf5   : > { %4339 = vmatpush2.bf16.msra.mxu0 %v6096_v14  ;;  %v6164_v14 = vld [vmem:[%s7052_s10 + $0xc64] ss:$16 sps:$4 sm:$0xff]  }
  0xf6   : > { %4382 = vmatpush2.bf16.msra.mxu1 %v6099_v15  ;;  %4340 = vmatprep.subr.bf16.mxu0 %v6104_v16  ;;  %v6167_v15 = vld [vmem:[%s7052_s10 + $0xe64] ss:$16 sps:$4 sm:$0xff]   ;;  %v6162_v16 = vld [vmem:[%s7052_s10 + $0xc60] ss:$16 sps:$4 sm:$0xff]  }
  0xf7   : > { %4383 = vmatprep.subr.bf16.mxu1 %v6107_v17  ;;  %v6165_v17 = vld [vmem:[%s7052_s10 + $0xe60] ss:$16 sps:$4 sm:$0xff]  }
  0xf9   : > { %4341 = vmatpush2.bf16.msra.mxu0 %v6102_v18  ;;  %v6170_v18 = vld [vmem:[%s7052_s10 + $0xc44] ss:$16 sps:$4 sm:$0xff]  }
  0xfa   : > { %4384 = vmatpush2.bf16.msra.mxu1 %v6105_v19  ;;  %4342 = vmatprep.subr.bf16.mxu0 %v6110_v20  ;;  %v6173_v19 = vld [vmem:[%s7052_s10 + $0xe44] ss:$16 sps:$4 sm:$0xff]   ;;  %v6168_v20 = vld [vmem:[%s7052_s10 + $0xc40] ss:$16 sps:$4 sm:$0xff]  }
  0xfb   : > { %4385 = vmatprep.subr.bf16.mxu1 %v6113_v21  ;;  %v6171_v21 = vld [vmem:[%s7052_s10 + $0xe40] ss:$16 sps:$4 sm:$0xff]  }
  0xfd   : > { %4343 = vmatpush2.bf16.msra.mxu0 %v6108_v22  ;;  %v6176_v22 = vld [vmem:[%s7052_s10 + $0xc24] ss:$16 sps:$4 sm:$0xff]  }
  0xfe   : > { %4386 = vmatpush2.bf16.msra.mxu1 %v6111_v23  ;;  %4344 = vmatprep.subr.bf16.mxu0 %v6116_v24  ;;  %v6179_v23 = vld [vmem:[%s7052_s10 + $0xe24] ss:$16 sps:$4 sm:$0xff]   ;;  %v6174_v24 = vld [vmem:[%s7052_s10 + $0xc20] ss:$16 sps:$4 sm:$0xff]  }
  0xff   : > { %4387 = vmatprep.subr.bf16.mxu1 %v6119_v25  ;;  %v6177_v25 = vld [vmem:[%s7052_s10 + $0xe20] ss:$16 sps:$4 sm:$0xff]  }
 0x101   : > { %4345 = vmatpush2.bf16.msra.mxu0 %v6114_v26  ;;  %v6182_v26 = vld [vmem:[%s7052_s10 + $0xc04] ss:$16 sps:$4 sm:$0xff]  }
 0x102   : > { %4388 = vmatpush2.bf16.msra.mxu1 %v6117_v27  ;;  %4346 = vmatprep.subr.bf16.mxu0 %v6122_v30  ;;  %v6185_v27 = vld [vmem:[%s7052_s10 + $0xe04] ss:$16 sps:$4 sm:$0xff]   ;;  %v6180_v30 = vld [vmem:[%s7052_s10 + $0xc00] ss:$16 sps:$4 sm:$0xff]  }
 0x103   : > { %4389 = vmatprep.subr.bf16.mxu1 %v6125_v31  ;;  %v6183_v31 = vld [vmem:[%s7052_s10 + $0xe00] ss:$16 sps:$4 sm:$0xff]  }
 0x105   : > { %4347 = vmatpush2.bf16.msra.mxu0 %v6120_v32  ;;  %v6188_v32 = vld [vmem:[%s7052_s10 + $0xde4] ss:$16 sps:$4 sm:$0xff]  }
 0x106   : > { %4390 = vmatpush2.bf16.msra.mxu1 %v6123_v33  ;;  %4348 = vmatprep.subr.bf16.mxu0 %v6128_v34  ;;  %v6191_v33 = vld [vmem:[%s7052_s10 + $0xfe4] ss:$16 sps:$4 sm:$0xff]   ;;  %v6186_v34 = vld [vmem:[%s7052_s10 + $0xde0] ss:$16 sps:$4 sm:$0xff]  }
 0x107   : > { %4391 = vmatprep.subr.bf16.mxu1 %v6131_v35  ;;  %v6189_v35 = vld [vmem:[%s7052_s10 + $0xfe0] ss:$16 sps:$4 sm:$0xff]  }
 0x109   : > { %4349 = vmatpush2.bf16.msra.mxu0 %v6126_v36  ;;  %v6194_v36 = vld [vmem:[%s7052_s10 + $0xdc4] ss:$16 sps:$4 sm:$0xff]  }
 0x10a   : > { %4392 = vmatpush2.bf16.msra.mxu1 %v6129_v37  ;;  %4350 = vmatprep.subr.bf16.mxu0 %v6134_v38  ;;  %v6197_v37 = vld [vmem:[%s7052_s10 + $0xfc4] ss:$16 sps:$4 sm:$0xff]   ;;  %v6192_v38 = vld [vmem:[%s7052_s10 + $0xdc0] ss:$16 sps:$4 sm:$0xff]  }
 0x10b   : > { %4393 = vmatprep.subr.bf16.mxu1 %v6137_v39  ;;  %v6195_v39 = vld [vmem:[%s7052_s10 + $0xfc0] ss:$16 sps:$4 sm:$0xff]  }
 0x10d   : > { %4351 = vmatpush2.bf16.msra.mxu0 %v6132_v41  ;;  %v6200_v41 = vld [vmem:[%s7052_s10 + $0xda4] ss:$16 sps:$4 sm:$0xff]  }
 0x10e   : > { %4394 = vmatpush2.bf16.msra.mxu1 %v6135_v42  ;;  %4406 = vmatprep.subr.bf16.mxu0 %v6140_v50  ;;  %v6203_v42 = vld [vmem:[%s7052_s10 + $0xfa4] ss:$16 sps:$4 sm:$0xff]   ;;  %v6204_v50 = vld [vmem:[%s7052_s10 + $0xd80] ss:$16 sps:$4 sm:$0xff]  }
 0x10f   : > { %4449 = vmatprep.subr.bf16.mxu1 %v6143_v51  ;;  %v6207_v51 = vld [vmem:[%s7052_s10 + $0xf80] ss:$16 sps:$4 sm:$0xff]  }
 0x110   : > { %4353 = vmatmul.mubr.bf16.vlgmr.msra.gmra.mxu0 %v7372_v58 }
 0x111   : > { %4396 = vmatmul.mubr.bf16.vlgmr.msra.gmra.mxu1 %v7374_v59  ;;  %4407 = vmatpush1.bf16.msra.mxu0 %v6138_v55  ;;  %v6215_v55 = vld [vmem:[%s7052_s10 + $0xf64] ss:$16 sps:$4 sm:$0xff]  }
 0x112   : > { %4450 = vmatpush1.bf16.msra.mxu1 %v6141_v61  ;;  %4408 = vmatprep.subr.bf16.mxu0 %v6146_v62  ;;  %v6221_v61 = vld [vmem:[%s7052_s10 + $0xf44] ss:$16 sps:$4 sm:$0xff]   ;;  %v6216_v62 = vld [vmem:[%s7052_s10 + $0xd40] ss:$16 sps:$4 sm:$0xff]  }
 0x113   : > { %4451 = vmatprep.subr.bf16.mxu1 %v6149_v63  ;;  %4438 = vmatprep.mubr.bf16.mxu0 %v7382_v0  ;;  %v6219_v63 = vld [vmem:[%s7052_s10 + $0xf40] ss:$16 sps:$4 sm:$0xff]  }
 0x114   : > { %4481 = vmatprep.mubr.bf16.mxu1 %v7384_v1 }
 0x115   : > { %4409 = vmatpush1.bf16.msra.mxu0 %v6144_v2  ;;  %v6224_v2 = vld [vmem:[%s7052_s10 + $0xd24] ss:$16 sps:$4 sm:$0xff]  }
 0x116   : > { %4452 = vmatpush1.bf16.msra.mxu1 %v6147_v3  ;;  %4410 = vmatprep.subr.bf16.mxu0 %v6152_v4  ;;  %v6227_v3 = vld [vmem:[%s7052_s10 + $0xf24] ss:$16 sps:$4 sm:$0xff]   ;;  %v6222_v4 = vld [vmem:[%s7052_s10 + $0xd20] ss:$16 sps:$4 sm:$0xff]  }
 0x117   : > { %4453 = vmatprep.subr.bf16.mxu1 %v6155_v5  ;;  %v6225_v5 = vld [vmem:[%s7052_s10 + $0xf20] ss:$16 sps:$4 sm:$0xff]  }
 0x119   : > { %4411 = vmatpush1.bf16.msra.mxu0 %v6150_v6  ;;  %v6230_v6 = vld [vmem:[%s7052_s10 + $0xd04] ss:$16 sps:$4 sm:$0xff]  }
 0x11a   : > { %4454 = vmatpush1.bf16.msra.mxu1 %v6153_v7  ;;  %4412 = vmatprep.subr.bf16.mxu0 %v6158_v8  ;;  %v6233_v7 = vld [vmem:[%s7052_s10 + $0xf04] ss:$16 sps:$4 sm:$0xff]   ;;  %v6228_v8 = vld [vmem:[%s7052_s10 + $0xd00] ss:$16 sps:$4 sm:$0xff]  }
 0x11b   : > { %4455 = vmatprep.subr.bf16.mxu1 %v6161_v9  ;;  %v6231_v9 = vld [vmem:[%s7052_s10 + $0xf00] ss:$16 sps:$4 sm:$0xff]  }
 0x11d   : > { %4413 = vmatpush1.bf16.msra.mxu0 %v6156_v10  ;;  %v238_v10 = vld [vmem:[%s8011_s0 + $0x60] sm:$0xff] }
 0x11e   : > { %4456 = vmatpush1.bf16.msra.mxu1 %v6159_v11  ;;  %4414 = vmatprep.subr.bf16.mxu0 %v6164_v14  ;;  %v258_v11 = vld [vmem:[%s8011_s0 + $0x100] sm:$0xff]  ;;  %v240_v14 = vld [vmem:[%s8011_s0 + $0x70] sm:$0xff] }
 0x11f   : > { %4457 = vmatprep.subr.bf16.mxu1 %v6167_v15  ;;  %v260_v15 = vld [vmem:[%s8011_s0 + $0x110] sm:$0xff] }
 0x121   : > { %4415 = vmatpush1.bf16.msra.mxu0 %v6162_v16  ;;  %v6236_v16 = vld [vmem:[%s7052_s10 + $0x10e4] ss:$16 sps:$4 sm:$0xff]  }
 0x122   : > { %4458 = vmatpush1.bf16.msra.mxu1 %v6165_v17  ;;  %4416 = vmatprep.subr.bf16.mxu0 %v6170_v18  ;;  %v6239_v17 = vld [vmem:[%s7052_s10 + $0x12e4] ss:$16 sps:$4 sm:$0xff]   ;;  %v243_v18 = vld [vmem:[%s8011_s0 + $0x88] sm:$0xff] }
 0x123   : > { %4459 = vmatprep.subr.bf16.mxu1 %v6173_v19  ;;  %v6234_v19 = vld [vmem:[%s7052_s10 + $0x10e0] ss:$16 sps:$4 sm:$0xff]  }
 0x125   : > { %4417 = vmatpush1.bf16.msra.mxu0 %v6168_v20  ;;  %v263_v20 = vld [vmem:[%s8011_s0 + $0x128] sm:$0xff] }
 0x126   : > { %4460 = vmatpush1.bf16.msra.mxu1 %v6171_v21  ;;  %4418 = vmatprep.subr.bf16.mxu0 %v6176_v22  ;;  %v245_v21 = vld [vmem:[%s8011_s0 + $0x98] sm:$0xff]  ;;  %v7472_v22 = vpack.c.bf16 %v258_v11, %v238_v10  ;;  %v6288_v10 = vld [vmem:[%s7052_s10 + $0x11c0] ss:$16 sps:$4 sm:$0xff]  }
 0x127   : > { %4461 = vmatprep.subr.bf16.mxu1 %v6179_v23  ;;  %v7474_v23 = vpack.c.bf16 %v260_v15, %v240_v14  ;;  %v6291_v11 = vld [vmem:[%s7052_s10 + $0x13c0] ss:$16 sps:$4 sm:$0xff]   ;;  %v6296_v14 = vld [vmem:[%s7052_s10 + $0x11a4] ss:$16 sps:$4 sm:$0xff]  }
 0x128   : > { %v6299_v15 = vld [vmem:[%s7052_s10 + $0x13a4] ss:$16 sps:$4 sm:$0xff]  }
 0x129   : > { %4419 = vmatpush1.bf16.msra.mxu0 %v6174_v24  ;;  %v265_v24 = vld [vmem:[%s8011_s0 + $0x138] sm:$0xff] }
 0x12a   : > { %4462 = vmatpush1.bf16.msra.mxu1 %v6177_v25  ;;  %4420 = vmatprep.subr.bf16.mxu0 %v6182_v26  ;;  %v6237_v25 = vld [vmem:[%s7052_s10 + $0x12e0] ss:$16 sps:$4 sm:$0xff]   ;;  %v6242_v26 = vld [vmem:[%s7052_s10 + $0x10c4] ss:$16 sps:$4 sm:$0xff]  }
 0x12b   : > { %4463 = vmatprep.subr.bf16.mxu1 %v6185_v27  ;;  %v6245_v27 = vld [vmem:[%s7052_s10 + $0x12c4] ss:$16 sps:$4 sm:$0xff]  }
 0x12d   : > { %4421 = vmatpush1.bf16.msra.mxu0 %v6180_v30  ;;  %v7482_v30 = vpack.c.bf16 %v263_v20, %v243_v18  ;;  %v6302_v18 = vld [vmem:[%s7052_s10 + $0x1184] ss:$16 sps:$4 sm:$0xff]   ;;  %v6300_v20 = vld [vmem:[%s7052_s10 + $0x1180] ss:$16 sps:$4 sm:$0xff]  }
 0x12e   : > { %4464 = vmatpush1.bf16.msra.mxu1 %v6183_v31  ;;  %4422 = vmatprep.subr.bf16.mxu0 %v6188_v32  ;;  %v7484_v31 = vpack.c.bf16 %v265_v24, %v245_v21  ;;  %v6240_v32 = vld [vmem:[%s7052_s10 + $0x10c0] ss:$16 sps:$4 sm:$0xff]   ;;  %v6308_v24 = vld [vmem:[%s7052_s10 + $0x1164] ss:$16 sps:$4 sm:$0xff]  }
 0x12f   : > { %4465 = vmatprep.subr.bf16.mxu1 %v6191_v33  ;;  %v6243_v33 = vld [vmem:[%s7052_s10 + $0x12c0] ss:$16 sps:$4 sm:$0xff]  }
 0x130   : > { %v6303_v21 = vld [vmem:[%s7052_s10 + $0x1380] ss:$16 sps:$4 sm:$0xff]  }
 0x131   : > { %4423 = vmatpush2.bf16.msra.mxu0 %v6186_v34  ;;  %v6248_v34 = vld [vmem:[%s7052_s10 + $0x10a4] ss:$16 sps:$4 sm:$0xff]  }
 0x132   : > { %4466 = vmatpush2.bf16.msra.mxu1 %v6189_v35  ;;  %4424 = vmatprep.subr.bf16.mxu0 %v6194_v36  ;;  %v6251_v35 = vld [vmem:[%s7052_s10 + $0x12a4] ss:$16 sps:$4 sm:$0xff]   ;;  %v6246_v36 = vld [vmem:[%s7052_s10 + $0x10a0] ss:$16 sps:$4 sm:$0xff]  }
 0x133   : > { %4467 = vmatprep.subr.bf16.mxu1 %v6197_v37  ;;  %v6249_v37 = vld [vmem:[%s7052_s10 + $0x12a0] ss:$16 sps:$4 sm:$0xff]  }
 0x135   : > { %4425 = vmatpush2.bf16.msra.mxu0 %v6192_v38  ;;  %v6254_v38 = vld [vmem:[%s7052_s10 + $0x1084] ss:$16 sps:$4 sm:$0xff]  }
 0x136   : > { %4468 = vmatpush2.bf16.msra.mxu1 %v6195_v39  ;;  %4426 = vmatprep.subr.bf16.mxu0 %v6200_v41  ;;  %v6257_v39 = vld [vmem:[%s7052_s10 + $0x1284] ss:$16 sps:$4 sm:$0xff]   ;;  %v6252_v41 = vld [vmem:[%s7052_s10 + $0x1080] ss:$16 sps:$4 sm:$0xff]  }
 0x137   : > { %4469 = vmatprep.subr.bf16.mxu1 %v6203_v42  ;;  %v6255_v42 = vld [vmem:[%s7052_s10 + $0x1280] ss:$16 sps:$4 sm:$0xff]  }
 0x139   : > { %4427 = vmatpush2.bf16.msra.mxu0 %v6198_v43  ;;  %v6260_v43 = vld [vmem:[%s7052_s10 + $0x1064] ss:$16 sps:$4 sm:$0xff]  }
 0x13a   : > { %4470 = vmatpush2.bf16.msra.mxu1 %v6201_v44  ;;  %4428 = vmatprep.subr.bf16.mxu0 %v6206_v48  ;;  %v6263_v44 = vld [vmem:[%s7052_s10 + $0x1264] ss:$16 sps:$4 sm:$0xff]   ;;  %v6258_v48 = vld [vmem:[%s7052_s10 + $0x1060] ss:$16 sps:$4 sm:$0xff]  }
 0x13b   : > { %4471 = vmatprep.subr.bf16.mxu1 %v6209_v49  ;;  %v6261_v49 = vld [vmem:[%s7052_s10 + $0x1260] ss:$16 sps:$4 sm:$0xff]  }
 0x13d   : > { %4429 = vmatpush2.bf16.msra.mxu0 %v6204_v50  ;;  %v6266_v50 = vld [vmem:[%s7052_s10 + $0x1044] ss:$16 sps:$4 sm:$0xff]  }
 0x13e   : > { %4472 = vmatpush2.bf16.msra.mxu1 %v6207_v51  ;;  %4430 = vmatprep.subr.bf16.mxu0 %v6212_v52  ;;  %v6269_v51 = vld [vmem:[%s7052_s10 + $0x1244] ss:$16 sps:$4 sm:$0xff]   ;;  %v6264_v52 = vld [vmem:[%s7052_s10 + $0x1040] ss:$16 sps:$4 sm:$0xff]  }
 0x13f   : > { %4473 = vmatprep.subr.bf16.mxu1 %v6215_v55  ;;  %v6267_v55 = vld [vmem:[%s7052_s10 + $0x1240] ss:$16 sps:$4 sm:$0xff]  }
 0x141   : > { %4431 = vmatpush2.bf16.msra.mxu0 %v6210_v56  ;;  %v6272_v56 = vld [vmem:[%s7052_s10 + $0x1024] ss:$16 sps:$4 sm:$0xff]  }
 0x142   : > { %4474 = vmatpush2.bf16.msra.mxu1 %v6213_v57  ;;  %4432 = vmatprep.subr.bf16.mxu0 %v6218_v60  ;;  %v6275_v57 = vld [vmem:[%s7052_s10 + $0x1224] ss:$16 sps:$4 sm:$0xff]   ;;  %v6270_v60 = vld [vmem:[%s7052_s10 + $0x1020] ss:$16 sps:$4 sm:$0xff]  }
 0x143   : > { %4475 = vmatprep.subr.bf16.mxu1 %v6221_v61  ;;  %v6273_v61 = vld [vmem:[%s7052_s10 + $0x1220] ss:$16 sps:$4 sm:$0xff]  }
 0x145   : > { %4433 = vmatpush2.bf16.msra.mxu0 %v6216_v62  ;;  %v6278_v62 = vld [vmem:[%s7052_s10 + $0x1004] ss:$16 sps:$4 sm:$0xff]  }
 0x146   : > { %4476 = vmatpush2.bf16.msra.mxu1 %v6219_v63  ;;  %4434 = vmatprep.subr.bf16.mxu0 %v6224_v2  ;;  %v6281_v63 = vld [vmem:[%s7052_s10 + $0x1204] ss:$16 sps:$4 sm:$0xff]   ;;  %v6276_v2 = vld [vmem:[%s7052_s10 + $0x1000] ss:$16 sps:$4 sm:$0xff]  }
 0x147   : > { %4477 = vmatprep.subr.bf16.mxu1 %v6227_v3  ;;  %v6279_v3 = vld [vmem:[%s7052_s10 + $0x1200] ss:$16 sps:$4 sm:$0xff]  }
 0x149   : > { %4435 = vmatpush2.bf16.msra.mxu0 %v6222_v4  ;;  %v6284_v4 = vld [vmem:[%s7052_s10 + $0x11e4] ss:$16 sps:$4 sm:$0xff]  }
 0x14a   : > { %4478 = vmatpush2.bf16.msra.mxu1 %v6225_v5  ;;  %4436 = vmatprep.subr.bf16.mxu0 %v6230_v6  ;;  %v6287_v5 = vld [vmem:[%s7052_s10 + $0x13e4] ss:$16 sps:$4 sm:$0xff]   ;;  %v6282_v6 = vld [vmem:[%s7052_s10 + $0x11e0] ss:$16 sps:$4 sm:$0xff]  }
 0x14b   : > { %4479 = vmatprep.subr.bf16.mxu1 %v6233_v7  ;;  %v6285_v7 = vld [vmem:[%s7052_s10 + $0x13e0] ss:$16 sps:$4 sm:$0xff]  }
 0x14d   : > { %4437 = vmatpush2.bf16.msra.mxu0 %v6228_v8  ;;  %v6290_v8 = vld [vmem:[%s7052_s10 + $0x11c4] ss:$16 sps:$4 sm:$0xff]  }
 0x14e   : > { %4480 = vmatpush2.bf16.msra.mxu1 %v6231_v9  ;;  %4492 = vmatprep.subr.bf16.mxu0 %v6236_v16  ;;  %v6293_v9 = vld [vmem:[%s7052_s10 + $0x13c4] ss:$16 sps:$4 sm:$0xff]   ;;  %v6294_v16 = vld [vmem:[%s7052_s10 + $0x11a0] ss:$16 sps:$4 sm:$0xff]  }
 0x14f   : > { %4535 = vmatprep.subr.bf16.mxu1 %v6239_v17  ;;  %v6297_v17 = vld [vmem:[%s7052_s10 + $0x13a0] ss:$16 sps:$4 sm:$0xff]  }
 0x150   : > { %4439 = vmatmul.mubr.bf16.vlgmr.msra.gmra.mxu0 %v7472_v22 }
 0x151   : > { %4482 = vmatmul.mubr.bf16.vlgmr.msra.gmra.mxu1 %v7474_v23  ;;  %4493 = vmatpush1.bf16.msra.mxu0 %v6234_v19  ;;  %v6305_v19 = vld [vmem:[%s7052_s10 + $0x1384] ss:$16 sps:$4 sm:$0xff]  }
 0x152   : > { %4536 = vmatpush1.bf16.msra.mxu1 %v6237_v25  ;;  %4494 = vmatprep.subr.bf16.mxu0 %v6242_v26  ;;  %v6311_v25 = vld [vmem:[%s7052_s10 + $0x1364] ss:$16 sps:$4 sm:$0xff]   ;;  %v6306_v26 = vld [vmem:[%s7052_s10 + $0x1160] ss:$16 sps:$4 sm:$0xff]  }
 0x153   : > { %4537 = vmatprep.subr.bf16.mxu1 %v6245_v27  ;;  %4524 = vmatprep.mubr.bf16.mxu0 %v7482_v30  ;;  %v6309_v27 = vld [vmem:[%s7052_s10 + $0x1360] ss:$16 sps:$4 sm:$0xff]  }
 0x154   : > { %4567 = vmatprep.mubr.bf16.mxu1 %v7484_v31 }
 0x155   : > { %4495 = vmatpush1.bf16.msra.mxu0 %v6240_v32  ;;  %v6314_v32 = vld [vmem:[%s7052_s10 + $0x1144] ss:$16 sps:$4 sm:$0xff]  }
 0x156   : > { %4538 = vmatpush1.bf16.msra.mxu1 %v6243_v33  ;;  %4496 = vmatprep.subr.bf16.mxu0 %v6248_v34  ;;  %v6317_v33 = vld [vmem:[%s7052_s10 + $0x1344] ss:$16 sps:$4 sm:$0xff]   ;;  %v6312_v34 = vld [vmem:[%s7052_s10 + $0x1140] ss:$16 sps:$4 sm:$0xff]  }
 0x157   : > { %4539 = vmatprep.subr.bf16.mxu1 %v6251_v35  ;;  %v6315_v35 = vld [vmem:[%s7052_s10 + $0x1340] ss:$16 sps:$4 sm:$0xff]  }
 0x159   : > { %4497 = vmatpush1.bf16.msra.mxu0 %v6246_v36  ;;  %v6320_v36 = vld [vmem:[%s7052_s10 + $0x1124] ss:$16 sps:$4 sm:$0xff]  }
 0x15a   : > { %4540 = vmatpush1.bf16.msra.mxu1 %v6249_v37  ;;  %4498 = vmatprep.subr.bf16.mxu0 %v6254_v38  ;;  %v6323_v37 = vld [vmem:[%s7052_s10 + $0x1324] ss:$16 sps:$4 sm:$0xff]   ;;  %v6318_v38 = vld [vmem:[%s7052_s10 + $0x1120] ss:$16 sps:$4 sm:$0xff]  }
 0x15b   : > { %4541 = vmatprep.subr.bf16.mxu1 %v6257_v39  ;;  %v6321_v39 = vld [vmem:[%s7052_s10 + $0x1320] ss:$16 sps:$4 sm:$0xff]  }
 0x15d   : > { %4499 = vmatpush1.bf16.msra.mxu0 %v6252_v41  ;;  %v6326_v41 = vld [vmem:[%s7052_s10 + $0x1104] ss:$16 sps:$4 sm:$0xff]  }
 0x15e   : > { %4542 = vmatpush1.bf16.msra.mxu1 %v6255_v42  ;;  %4500 = vmatprep.subr.bf16.mxu0 %v6260_v43  ;;  %v6329_v42 = vld [vmem:[%s7052_s10 + $0x1304] ss:$16 sps:$4 sm:$0xff]   ;;  %v6324_v43 = vld [vmem:[%s7052_s10 + $0x1100] ss:$16 sps:$4 sm:$0xff]  }
 0x15f   : > { %4543 = vmatprep.subr.bf16.mxu1 %v6263_v44  ;;  %v6327_v44 = vld [vmem:[%s7052_s10 + $0x1300] ss:$16 sps:$4 sm:$0xff]  }
 0x161   : > { %4501 = vmatpush1.bf16.msra.mxu0 %v6258_v48  ;;  %v242_v48 = vld [vmem:[%s8011_s0 + $0x80] sm:$0xff] }
 0x162   : > { %4544 = vmatpush1.bf16.msra.mxu1 %v6261_v49  ;;  %4502 = vmatprep.subr.bf16.mxu0 %v6266_v50  ;;  %v262_v49 = vld [vmem:[%s8011_s0 + $0x120] sm:$0xff]  ;;  %v244_v50 = vld [vmem:[%s8011_s0 + $0x90] sm:$0xff] }
 0x163   : > { %4545 = vmatprep.subr.bf16.mxu1 %v6269_v51  ;;  %v264_v51 = vld [vmem:[%s8011_s0 + $0x130] sm:$0xff] }
 0x165   : > { %4503 = vmatpush1.bf16.msra.mxu0 %v6264_v52  ;;  %v6332_v52 = vld [vmem:[%s7052_s10 + $0xec] ss:$16 sps:$4 sm:$0xff]  }
 0x166   : > { %4546 = vmatpush1.bf16.msra.mxu1 %v6267_v55  ;;  %4504 = vmatprep.subr.bf16.mxu0 %v6272_v56  ;;  %v6335_v55 = vld [vmem:[%s7052_s10 + $0x2ec] ss:$16 sps:$4 sm:$0xff]   ;;  %v6330_v56 = vld [vmem:[%s7052_s10 + $0xe8] ss:$16 sps:$4 sm:$0xff]  }
 0x167   : > { %4547 = vmatprep.subr.bf16.mxu1 %v6275_v57  ;;  %v6333_v57 = vld [vmem:[%s7052_s10 + $0x2e8] ss:$16 sps:$4 sm:$0xff]  }
 0x169   : > { %4505 = vmatpush1.bf16.msra.mxu0 %v6270_v60  ;;  %v7564_v60 = vpack.c.bf16 %v262_v49, %v242_v48  ;;  %v6390_v48 = vld [vmem:[%s7052_s10 + $0x1a8] ss:$16 sps:$4 sm:$0xff]  }
 0x16a   : > { %4548 = vmatpush1.bf16.msra.mxu1 %v6273_v61  ;;  %4506 = vmatprep.subr.bf16.mxu0 %v6278_v62  ;;  %v7566_v61 = vpack.c.bf16 %v264_v51, %v244_v50  ;;  %v6338_v62 = vld [vmem:[%s7052_s10 + $0xcc] ss:$16 sps:$4 sm:$0xff]   ;;  %v6393_v49 = vld [vmem:[%s7052_s10 + $0x3a8] ss:$16 sps:$4 sm:$0xff]  }
 0x16b   : > { %4549 = vmatprep.subr.bf16.mxu1 %v6281_v63  ;;  %v6341_v63 = vld [vmem:[%s7052_s10 + $0x2cc] ss:$16 sps:$4 sm:$0xff]  }
 0x16c   : > { %v6398_v50 = vld [vmem:[%s7052_s10 + $0x18c] ss:$16 sps:$4 sm:$0xff]  }
 0x16d   : > { %4507 = vmatpush1.bf16.msra.mxu0 %v6276_v2  ;;  %v6336_v2 = vld [vmem:[%s7052_s10 + $0xc8] ss:$16 sps:$4 sm:$0xff]   ;;  %v6401_v51 = vld [vmem:[%s7052_s10 + $0x38c] ss:$16 sps:$4 sm:$0xff]  }
 0x16e   : > { %4550 = vmatpush1.bf16.msra.mxu1 %v6279_v3  ;;  %4508 = vmatprep.subr.bf16.mxu0 %v6284_v4  ;;  %v6339_v3 = vld [vmem:[%s7052_s10 + $0x2c8] ss:$16 sps:$4 sm:$0xff]   ;;  %v6344_v4 = vld [vmem:[%s7052_s10 + $0xac] ss:$16 sps:$4 sm:$0xff]  }
 0x16f   : > { %4551 = vmatprep.subr.bf16.mxu1 %v6287_v5  ;;  %v6347_v5 = vld [vmem:[%s7052_s10 + $0x2ac] ss:$16 sps:$4 sm:$0xff]  }
 0x171   : > { %4509 = vmatpush2.bf16.msra.mxu0 %v6282_v6  ;;  %v6342_v6 = vld [vmem:[%s7052_s10 + $0xa8] ss:$16 sps:$4 sm:$0xff]  }
 0x172   : > { %4552 = vmatpush2.bf16.msra.mxu1 %v6285_v7  ;;  %4510 = vmatprep.subr.bf16.mxu0 %v6290_v8  ;;  %v6345_v7 = vld [vmem:[%s7052_s10 + $0x2a8] ss:$16 sps:$4 sm:$0xff]   ;;  %v6350_v8 = vld [vmem:[%s7052_s10 + $0x8c] ss:$16 sps:$4 sm:$0xff]  }
 0x173   : > { %4553 = vmatprep.subr.bf16.mxu1 %v6293_v9  ;;  %v6353_v9 = vld [vmem:[%s7052_s10 + $0x28c] ss:$16 sps:$4 sm:$0xff]  }
 0x175   : > { %4511 = vmatpush2.bf16.msra.mxu0 %v6288_v10  ;;  %v6348_v10 = vld [vmem:[%s7052_s10 + $0x88] ss:$16 sps:$4 sm:$0xff]  }
 0x176   : > { %4554 = vmatpush2.bf16.msra.mxu1 %v6291_v11  ;;  %4512 = vmatprep.subr.bf16.mxu0 %v6296_v14  ;;  %v6351_v11 = vld [vmem:[%s7052_s10 + $0x288] ss:$16 sps:$4 sm:$0xff]  }
 0x177   : > { %4555 = vmatprep.subr.bf16.mxu1 %v6299_v15  ;;  %v6354_v14 = vld [vmem:[%s7052_s10 + $0x68] ss:$16 sps:$4 sm:$0xff]  }
 0x178   : > { %v6357_v15 = vld [vmem:[%s7052_s10 + $0x268] ss:$16 sps:$4 sm:$0xff]  }
 0x179   : > { %4513 = vmatpush2.bf16.msra.mxu0 %v6294_v16  ;;  %v6362_v16 = vld [vmem:[%s7052_s10 + $0x4c] ss:$16 sps:$4 sm:$0xff]  }
 0x17a   : > { %4556 = vmatpush2.bf16.msra.mxu1 %v6297_v17  ;;  %4514 = vmatprep.subr.bf16.mxu0 %v6302_v18  ;;  %v6365_v17 = vld [vmem:[%s7052_s10 + $0x24c] ss:$16 sps:$4 sm:$0xff]   ;;  %v6360_v18 = vld [vmem:[%s7052_s10 + $0x48] ss:$16 sps:$4 sm:$0xff]  }
 0x17b   : > { %4557 = vmatprep.subr.bf16.mxu1 %v6305_v19  ;;  %v6363_v19 = vld [vmem:[%s7052_s10 + $0x248] ss:$16 sps:$4 sm:$0xff]  }
 0x17d   : > { %4515 = vmatpush2.bf16.msra.mxu0 %v6300_v20  ;;  %v6368_v20 = vld [vmem:[%s7052_s10 + $0x2c] ss:$16 sps:$4 sm:$0xff]  }
 0x17e   : > { %4558 = vmatpush2.bf16.msra.mxu1 %v6303_v21  ;;  %4516 = vmatprep.subr.bf16.mxu0 %v6308_v24  ;;  %v6371_v21 = vld [vmem:[%s7052_s10 + $0x22c] ss:$16 sps:$4 sm:$0xff]   ;;  %v6366_v24 = vld [vmem:[%s7052_s10 + $0x28] ss:$16 sps:$4 sm:$0xff]  }
 0x17f   : > { %4559 = vmatprep.subr.bf16.mxu1 %v6311_v25  ;;  %v6369_v25 = vld [vmem:[%s7052_s10 + $0x228] ss:$16 sps:$4 sm:$0xff]  }
 0x181   : > { %4517 = vmatpush2.bf16.msra.mxu0 %v6306_v26  ;;  %v6374_v26 = vld [vmem:[%s7052_s10 + $0xc] ss:$16 sps:$4 sm:$0xff]  }
 0x182   : > { %4560 = vmatpush2.bf16.msra.mxu1 %v6309_v27  ;;  %4518 = vmatprep.subr.bf16.mxu0 %v6314_v32  ;;  %v6377_v27 = vld [vmem:[%s7052_s10 + $0x20c] ss:$16 sps:$4 sm:$0xff]   ;;  %v6372_v32 = vld [vmem:[%s7052_s10 + $0x8] ss:$16 sps:$4 sm:$0xff]  }
 0x183   : > { %4561 = vmatprep.subr.bf16.mxu1 %v6317_v33  ;;  %v6375_v33 = vld [vmem:[%s7052_s10 + $0x208] ss:$16 sps:$4 sm:$0xff]  }
 0x185   : > { %4519 = vmatpush2.bf16.msra.mxu0 %v6312_v34  ;;  %v6380_v34 = vld [vmem:[%s7052_s10 + $0x1ec] ss:$16 sps:$4 sm:$0xff]  }
 0x186   : > { %4562 = vmatpush2.bf16.msra.mxu1 %v6315_v35  ;;  %4520 = vmatprep.subr.bf16.mxu0 %v6320_v36  ;;  %v6383_v35 = vld [vmem:[%s7052_s10 + $0x3ec] ss:$16 sps:$4 sm:$0xff]   ;;  %v6378_v36 = vld [vmem:[%s7052_s10 + $0x1e8] ss:$16 sps:$4 sm:$0xff]  }
 0x187   : > { %4563 = vmatprep.subr.bf16.mxu1 %v6323_v37  ;;  %v6381_v37 = vld [vmem:[%s7052_s10 + $0x3e8] ss:$16 sps:$4 sm:$0xff]  }
 0x189   : > { %4521 = vmatpush2.bf16.msra.mxu0 %v6318_v38  ;;  %v6386_v38 = vld [vmem:[%s7052_s10 + $0x1cc] ss:$16 sps:$4 sm:$0xff]  }
 0x18a   : > { %4564 = vmatpush2.bf16.msra.mxu1 %v6321_v39  ;;  %4522 = vmatprep.subr.bf16.mxu0 %v6326_v41  ;;  %v6389_v39 = vld [vmem:[%s7052_s10 + $0x3cc] ss:$16 sps:$4 sm:$0xff]   ;;  %v6384_v41 = vld [vmem:[%s7052_s10 + $0x1c8] ss:$16 sps:$4 sm:$0xff]  }
 0x18b   : > { %4565 = vmatprep.subr.bf16.mxu1 %v6329_v42  ;;  %v6387_v42 = vld [vmem:[%s7052_s10 + $0x3c8] ss:$16 sps:$4 sm:$0xff]  }
 0x18d   : > { %4523 = vmatpush2.bf16.msra.mxu0 %v6324_v43  ;;  %v6392_v43 = vld [vmem:[%s7052_s10 + $0x1ac] ss:$16 sps:$4 sm:$0xff]  }
 0x18e   : > { %4566 = vmatpush2.bf16.msra.mxu1 %v6327_v44  ;;  %4578 = vmatprep.subr.bf16.mxu0 %v6332_v52  ;;  %v6395_v44 = vld [vmem:[%s7052_s10 + $0x3ac] ss:$16 sps:$4 sm:$0xff]   ;;  %v6396_v52 = vld [vmem:[%s7052_s10 + $0x188] ss:$16 sps:$4 sm:$0xff]  }
 0x18f   : > { %4621 = vmatprep.subr.bf16.mxu1 %v6335_v55  ;;  %v6399_v55 = vld [vmem:[%s7052_s10 + $0x388] ss:$16 sps:$4 sm:$0xff]  }
 0x190   : > { %4525 = vmatmul.mubr.bf16.vlgmr.msra.gmra.mxu0 %v7564_v60 }
 0x191   : > { %4568 = vmatmul.mubr.bf16.vlgmr.msra.gmra.mxu1 %v7566_v61  ;;  %4579 = vmatpush1.bf16.msra.mxu0 %v6330_v56  ;;  %v6404_v56 = vld [vmem:[%s7052_s10 + $0x16c] ss:$16 sps:$4 sm:$0xff]  }
 0x192   : > { %4622 = vmatpush1.bf16.msra.mxu1 %v6333_v57  ;;  %4580 = vmatprep.subr.bf16.mxu0 %v6338_v62  ;;  %v6407_v57 = vld [vmem:[%s7052_s10 + $0x36c] ss:$16 sps:$4 sm:$0xff]   ;;  %v6402_v62 = vld [vmem:[%s7052_s10 + $0x168] ss:$16 sps:$4 sm:$0xff]  }
 0x193   : > { %4623 = vmatprep.subr.bf16.mxu1 %v6341_v63  ;;  %4610 = vmatprep.mubr.bf16.mxu0 %v7127_v53  ;;  %v6356_v53 = vld [vmem:[%s7052_s10 + $0x6c] ss:$16 sps:$4 sm:$0xff]   ;;  %v6405_v63 = vld [vmem:[%s7052_s10 + $0x368] ss:$16 sps:$4 sm:$0xff]  }
 0x194   : > { %4653 = vmatprep.mubr.bf16.mxu1 %v7129_v54  ;;  %v6359_v54 = vld [vmem:[%s7052_s10 + $0x26c] ss:$16 sps:$4 sm:$0xff]  }
 0x195   : > { %4581 = vmatpush1.bf16.msra.mxu0 %v6336_v2  ;;  %v6410_v2 = vld [vmem:[%s7052_s10 + $0x14c] ss:$16 sps:$4 sm:$0xff]  }
 0x196   : > { %4624 = vmatpush1.bf16.msra.mxu1 %v6339_v3  ;;  %4582 = vmatprep.subr.bf16.mxu0 %v6344_v4  ;;  %v6413_v3 = vld [vmem:[%s7052_s10 + $0x34c] ss:$16 sps:$4 sm:$0xff]   ;;  %v6408_v4 = vld [vmem:[%s7052_s10 + $0x148] ss:$16 sps:$4 sm:$0xff]  }
 0x197   : > { %4625 = vmatprep.subr.bf16.mxu1 %v6347_v5  ;;  %v6411_v5 = vld [vmem:[%s7052_s10 + $0x348] ss:$16 sps:$4 sm:$0xff]  }
 0x199   : > { %4583 = vmatpush1.bf16.msra.mxu0 %v6342_v6  ;;  %v6416_v6 = vld [vmem:[%s7052_s10 + $0x12c] ss:$16 sps:$4 sm:$0xff]  }
 0x19a   : > { %4626 = vmatpush1.bf16.msra.mxu1 %v6345_v7  ;;  %4584 = vmatprep.subr.bf16.mxu0 %v6350_v8  ;;  %v6419_v7 = vld [vmem:[%s7052_s10 + $0x32c] ss:$16 sps:$4 sm:$0xff]   ;;  %v6414_v8 = vld [vmem:[%s7052_s10 + $0x128] ss:$16 sps:$4 sm:$0xff]  }
 0x19b   : > { %4627 = vmatprep.subr.bf16.mxu1 %v6353_v9  ;;  %v6417_v9 = vld [vmem:[%s7052_s10 + $0x328] ss:$16 sps:$4 sm:$0xff]  }
 0x19d   : > { %4585 = vmatpush1.bf16.msra.mxu0 %v6348_v10  ;;  %v6422_v10 = vld [vmem:[%s7052_s10 + $0x10c] ss:$16 sps:$4 sm:$0xff]  }
 0x19e   : > { %4628 = vmatpush1.bf16.msra.mxu1 %v6351_v11  ;;  %4586 = vmatprep.subr.bf16.mxu0 %v6356_v53  ;;  %v6425_v11 = vld [vmem:[%s7052_s10 + $0x30c] ss:$16 sps:$4 sm:$0xff]   ;;  %v6420_v53 = vld [vmem:[%s7052_s10 + $0x108] ss:$16 sps:$4 sm:$0xff]  }
 0x19f   : > { %4629 = vmatprep.subr.bf16.mxu1 %v6359_v54  ;;  %v6423_v54 = vld [vmem:[%s7052_s10 + $0x308] ss:$16 sps:$4 sm:$0xff]  }
 0x1a1   : > { %4587 = vmatpush1.bf16.msra.mxu0 %v6354_v14  ;;  %v6428_v14 = vld [vmem:[%s7052_s10 + $0x4ec] ss:$16 sps:$4 sm:$0xff]  }
 0x1a2   : > { %4630 = vmatpush1.bf16.msra.mxu1 %v6357_v15  ;;  %4588 = vmatprep.subr.bf16.mxu0 %v6362_v16  ;;  %v6431_v15 = vld [vmem:[%s7052_s10 + $0x6ec] ss:$16 sps:$4 sm:$0xff]   ;;  %v6426_v16 = vld [vmem:[%s7052_s10 + $0x4e8] ss:$16 sps:$4 sm:$0xff]  }
 0x1a3   : > { %4631 = vmatprep.subr.bf16.mxu1 %v6365_v17  ;;  %v6429_v17 = vld [vmem:[%s7052_s10 + $0x6e8] ss:$16 sps:$4 sm:$0xff]  }
 0x1a5   : > { %4589 = vmatpush1.bf16.msra.mxu0 %v6360_v18  ;;  %v6434_v18 = vld [vmem:[%s7052_s10 + $0x4cc] ss:$16 sps:$4 sm:$0xff]  }
 0x1a6   : > { %4632 = vmatpush1.bf16.msra.mxu1 %v6363_v19  ;;  %4590 = vmatprep.subr.bf16.mxu0 %v6368_v20  ;;  %v6437_v19 = vld [vmem:[%s7052_s10 + $0x6cc] ss:$16 sps:$4 sm:$0xff]   ;;  %v6432_v20 = vld [vmem:[%s7052_s10 + $0x4c8] ss:$16 sps:$4 sm:$0xff]  }
 0x1a7   : > { %4633 = vmatprep.subr.bf16.mxu1 %v6371_v21  ;;  %v6435_v21 = vld [vmem:[%s7052_s10 + $0x6c8] ss:$16 sps:$4 sm:$0xff]  }
 0x1a9   : > { %4591 = vmatpush1.bf16.msra.mxu0 %v6366_v24  ;;  %v6440_v24 = vld [vmem:[%s7052_s10 + $0x4ac] ss:$16 sps:$4 sm:$0xff]  }
 0x1aa   : > { %4634 = vmatpush1.bf16.msra.mxu1 %v6369_v25  ;;  %4592 = vmatprep.subr.bf16.mxu0 %v6374_v26  ;;  %v6443_v25 = vld [vmem:[%s7052_s10 + $0x6ac] ss:$16 sps:$4 sm:$0xff]   ;;  %v6438_v26 = vld [vmem:[%s7052_s10 + $0x4a8] ss:$16 sps:$4 sm:$0xff]  }
 0x1ab   : > { %4635 = vmatprep.subr.bf16.mxu1 %v6377_v27  ;;  %v6441_v27 = vld [vmem:[%s7052_s10 + $0x6a8] ss:$16 sps:$4 sm:$0xff]  }
 0x1ad   : > { %4593 = vmatpush1.bf16.msra.mxu0 %v6372_v32  ;;  %v6444_v32 = vld [vmem:[%s7052_s10 + $0x488] ss:$16 sps:$4 sm:$0xff]  }
 0x1ae   : > { %4636 = vmatpush1.bf16.msra.mxu1 %v6375_v33  ;;  %4594 = vmatprep.subr.bf16.mxu0 %v6380_v34  ;;  %v6447_v33 = vld [vmem:[%s7052_s10 + $0x688] ss:$16 sps:$4 sm:$0xff]  }
 0x1af   : > { %4637 = vmatprep.subr.bf16.mxu1 %v6383_v35  ;;  %v6450_v34 = vld [vmem:[%s7052_s10 + $0x468] ss:$16 sps:$4 sm:$0xff]  }
 0x1b0   : > { %v6453_v35 = vld [vmem:[%s7052_s10 + $0x668] ss:$16 sps:$4 sm:$0xff]  }
 0x1b1   : > { %4595 = vmatpush2.bf16.msra.mxu0 %v6378_v36  ;;  %v6458_v36 = vld [vmem:[%s7052_s10 + $0x44c] ss:$16 sps:$4 sm:$0xff]  }
 0x1b2   : > { %4638 = vmatpush2.bf16.msra.mxu1 %v6381_v37  ;;  %4596 = vmatprep.subr.bf16.mxu0 %v6386_v38  ;;  %v6461_v37 = vld [vmem:[%s7052_s10 + $0x64c] ss:$16 sps:$4 sm:$0xff]   ;;  %v6456_v38 = vld [vmem:[%s7052_s10 + $0x448] ss:$16 sps:$4 sm:$0xff]  }
 0x1b3   : > { %4639 = vmatprep.subr.bf16.mxu1 %v6389_v39  ;;  %v6459_v39 = vld [vmem:[%s7052_s10 + $0x648] ss:$16 sps:$4 sm:$0xff]  }
 0x1b5   : > { %4597 = vmatpush2.bf16.msra.mxu0 %v6384_v41  ;;  %v6464_v41 = vld [vmem:[%s7052_s10 + $0x42c] ss:$16 sps:$4 sm:$0xff]  }
 0x1b6   : > { %4640 = vmatpush2.bf16.msra.mxu1 %v6387_v42  ;;  %4598 = vmatprep.subr.bf16.mxu0 %v6392_v43  ;;  %v6467_v42 = vld [vmem:[%s7052_s10 + $0x62c] ss:$16 sps:$4 sm:$0xff]   ;;  %v6462_v43 = vld [vmem:[%s7052_s10 + $0x428] ss:$16 sps:$4 sm:$0xff]  }
 0x1b7   : > { %4641 = vmatprep.subr.bf16.mxu1 %v6395_v44  ;;  %v6465_v44 = vld [vmem:[%s7052_s10 + $0x628] ss:$16 sps:$4 sm:$0xff]  }
 0x1b9   : > { %4599 = vmatpush2.bf16.msra.mxu0 %v6390_v48  ;;  %v6470_v48 = vld [vmem:[%s7052_s10 + $0x40c] ss:$16 sps:$4 sm:$0xff]  }
 0x1ba   : > { %4642 = vmatpush2.bf16.msra.mxu1 %v6393_v49  ;;  %4600 = vmatprep.subr.bf16.mxu0 %v6398_v50  ;;  %v6473_v49 = vld [vmem:[%s7052_s10 + $0x60c] ss:$16 sps:$4 sm:$0xff]   ;;  %v6468_v50 = vld [vmem:[%s7052_s10 + $0x408] ss:$16 sps:$4 sm:$0xff]  }
 0x1bb   : > { %4643 = vmatprep.subr.bf16.mxu1 %v6401_v51  ;;  %v6471_v51 = vld [vmem:[%s7052_s10 + $0x608] ss:$16 sps:$4 sm:$0xff]  }
 0x1bd   : > { %4601 = vmatpush2.bf16.msra.mxu0 %v6396_v52  ;;  %v6476_v52 = vld [vmem:[%s7052_s10 + $0x5ec] ss:$16 sps:$4 sm:$0xff]  }
 0x1be   : > { %4644 = vmatpush2.bf16.msra.mxu1 %v6399_v55  ;;  %4602 = vmatprep.subr.bf16.mxu0 %v6404_v56  ;;  %v6479_v55 = vld [vmem:[%s7052_s10 + $0x7ec] ss:$16 sps:$4 sm:$0xff]   ;;  %v6474_v56 = vld [vmem:[%s7052_s10 + $0x5e8] ss:$16 sps:$4 sm:$0xff]  }
 0x1bf   : > { %4645 = vmatprep.subr.bf16.mxu1 %v6407_v57  ;;  %v6477_v57 = vld [vmem:[%s7052_s10 + $0x7e8] ss:$16 sps:$4 sm:$0xff]  }
 0x1c1   : > { %4603 = vmatpush2.bf16.msra.mxu0 %v6402_v62  ;;  %v6482_v62 = vld [vmem:[%s7052_s10 + $0x5cc] ss:$16 sps:$4 sm:$0xff]  }
 0x1c2   : > { %4646 = vmatpush2.bf16.msra.mxu1 %v6405_v63  ;;  %4604 = vmatprep.subr.bf16.mxu0 %v6410_v2  ;;  %v6485_v63 = vld [vmem:[%s7052_s10 + $0x7cc] ss:$16 sps:$4 sm:$0xff]   ;;  %v6480_v2 = vld [vmem:[%s7052_s10 + $0x5c8] ss:$16 sps:$4 sm:$0xff]  }
 0x1c3   : > { %4647 = vmatprep.subr.bf16.mxu1 %v6413_v3  ;;  %v6483_v3 = vld [vmem:[%s7052_s10 + $0x7c8] ss:$16 sps:$4 sm:$0xff]  }
 0x1c5   : > { %4605 = vmatpush2.bf16.msra.mxu0 %v6408_v4  ;;  %v6488_v4 = vld [vmem:[%s7052_s10 + $0x5ac] ss:$16 sps:$4 sm:$0xff]  }
 0x1c6   : > { %4648 = vmatpush2.bf16.msra.mxu1 %v6411_v5  ;;  %4606 = vmatprep.subr.bf16.mxu0 %v6416_v6  ;;  %v6491_v5 = vld [vmem:[%s7052_s10 + $0x7ac] ss:$16 sps:$4 sm:$0xff]   ;;  %v6486_v6 = vld [vmem:[%s7052_s10 + $0x5a8] ss:$16 sps:$4 sm:$0xff]  }
 0x1c7   : > { %4649 = vmatprep.subr.bf16.mxu1 %v6419_v7  ;;  %v6489_v7 = vld [vmem:[%s7052_s10 + $0x7a8] ss:$16 sps:$4 sm:$0xff]  }
 0x1c9   : > { %4607 = vmatpush2.bf16.msra.mxu0 %v6414_v8  ;;  %v6494_v8 = vld [vmem:[%s7052_s10 + $0x58c] ss:$16 sps:$4 sm:$0xff]  }
 0x1ca   : > { %4650 = vmatpush2.bf16.msra.mxu1 %v6417_v9  ;;  %4608 = vmatprep.subr.bf16.mxu0 %v6422_v10  ;;  %v6497_v9 = vld [vmem:[%s7052_s10 + $0x78c] ss:$16 sps:$4 sm:$0xff]   ;;  %v6492_v10 = vld [vmem:[%s7052_s10 + $0x588] ss:$16 sps:$4 sm:$0xff]  }
 0x1cb   : > { %4651 = vmatprep.subr.bf16.mxu1 %v6425_v11  ;;  %v6495_v11 = vld [vmem:[%s7052_s10 + $0x788] ss:$16 sps:$4 sm:$0xff]  }
 0x1cd   : > { %4609 = vmatpush2.bf16.msra.mxu0 %v6420_v53  ;;  %v6500_v53 = vld [vmem:[%s7052_s10 + $0x56c] ss:$16 sps:$4 sm:$0xff]  }
 0x1ce   : > { %4652 = vmatpush2.bf16.msra.mxu1 %v6423_v54  ;;  %4664 = vmatprep.subr.bf16.mxu0 %v6428_v14  ;;  %v6503_v54 = vld [vmem:[%s7052_s10 + $0x76c] ss:$16 sps:$4 sm:$0xff]   ;;  %v6498_v14 = vld [vmem:[%s7052_s10 + $0x568] ss:$16 sps:$4 sm:$0xff]  }
 0x1cf   : > { %4707 = vmatprep.subr.bf16.mxu1 %v6431_v15  ;;  %v6501_v15 = vld [vmem:[%s7052_s10 + $0x768] ss:$16 sps:$4 sm:$0xff]  }
 0x1d0   : > { %4611 = vmatmul.mubr.bf16.vlgmr.msra.gmra.mxu0 %v7162_v12  ;;  %v6446_v12 = vld [vmem:[%s7052_s10 + $0x48c] ss:$16 sps:$4 sm:$0xff]  }
 0x1d1   : > { %4654 = vmatmul.mubr.bf16.vlgmr.msra.gmra.mxu1 %v7164_v13  ;;  %4665 = vmatpush1.bf16.msra.mxu0 %v6426_v16  ;;  %v6449_v13 = vld [vmem:[%s7052_s10 + $0x68c] ss:$16 sps:$4 sm:$0xff]  }
 0x1d2   : > { %4708 = vmatpush1.bf16.msra.mxu1 %v6429_v17  ;;  %4666 = vmatprep.subr.bf16.mxu0 %v6434_v18  ;;  %v6506_v16 = vld [vmem:[%s7052_s10 + $0x54c] ss:$16 sps:$4 sm:$0xff]   ;;  %v6504_v18 = vld [vmem:[%s7052_s10 + $0x548] ss:$16 sps:$4 sm:$0xff]  }
 0x1d3   : > { %4709 = vmatprep.subr.bf16.mxu1 %v6437_v19  ;;  %4696 = vmatprep.mubr.bf16.mxu0 %v7205_v45  ;;  %v6452_v45 = vld [vmem:[%s7052_s10 + $0x46c] ss:$16 sps:$4 sm:$0xff]   ;;  %v6507_v19 = vld [vmem:[%s7052_s10 + $0x748] ss:$16 sps:$4 sm:$0xff]  }
 0x1d4   : > { %4739 = vmatprep.mubr.bf16.mxu1 %v7210_v47  ;;  %v6455_v47 = vld [vmem:[%s7052_s10 + $0x66c] ss:$16 sps:$4 sm:$0xff]  }
 0x1d5   : > { %4667 = vmatpush1.bf16.msra.mxu0 %v6432_v20  ;;  %v6509_v17 = vld [vmem:[%s7052_s10 + $0x74c] ss:$16 sps:$4 sm:$0xff]  }
 0x1d6   : > { %4710 = vmatpush1.bf16.msra.mxu1 %v6435_v21  ;;  %4668 = vmatprep.subr.bf16.mxu0 %v6440_v24  ;;  %v6512_v20 = vld [vmem:[%s7052_s10 + $0x52c] ss:$16 sps:$4 sm:$0xff]   ;;  %v6510_v24 = vld [vmem:[%s7052_s10 + $0x528] ss:$16 sps:$4 sm:$0xff]  }
 0x1d7   : > { %4711 = vmatprep.subr.bf16.mxu1 %v6443_v25  ;;  %v6515_v21 = vld [vmem:[%s7052_s10 + $0x72c] ss:$16 sps:$4 sm:$0xff]   ;;  %v6513_v25 = vld [vmem:[%s7052_s10 + $0x728] ss:$16 sps:$4 sm:$0xff]  }
 0x1d9   : > { %4669 = vmatpush1.bf16.msra.mxu0 %v6438_v26  ;;  %v6518_v26 = vld [vmem:[%s7052_s10 + $0x50c] ss:$16 sps:$4 sm:$0xff]  }
 0x1da   : > { %4712 = vmatpush1.bf16.msra.mxu1 %v6441_v27  ;;  %4670 = vmatprep.subr.bf16.mxu0 %v6446_v12  ;;  %v6521_v27 = vld [vmem:[%s7052_s10 + $0x70c] ss:$16 sps:$4 sm:$0xff]   ;;  %v6516_v12 = vld [vmem:[%s7052_s10 + $0x508] ss:$16 sps:$4 sm:$0xff]  }
 0x1db   : > { %4713 = vmatprep.subr.bf16.mxu1 %v6449_v13  ;;  %v6519_v13 = vld [vmem:[%s7052_s10 + $0x708] ss:$16 sps:$4 sm:$0xff]  }
 0x1dd   : > { %4671 = vmatpush1.bf16.msra.mxu0 %v6444_v32  ;;  %v6524_v32 = vld [vmem:[%s7052_s10 + $0x8ec] ss:$16 sps:$4 sm:$0xff]  }
 0x1de   : > { %4714 = vmatpush1.bf16.msra.mxu1 %v6447_v33  ;;  %4672 = vmatprep.subr.bf16.mxu0 %v6452_v45  ;;  %v6527_v33 = vld [vmem:[%s7052_s10 + $0xaec] ss:$16 sps:$4 sm:$0xff]   ;;  %v6522_v45 = vld [vmem:[%s7052_s10 + $0x8e8] ss:$16 sps:$4 sm:$0xff]  }
 0x1df   : > { %4715 = vmatprep.subr.bf16.mxu1 %v6455_v47  ;;  %v6525_v47 = vld [vmem:[%s7052_s10 + $0xae8] ss:$16 sps:$4 sm:$0xff]  }
 0x1e1   : > { %4673 = vmatpush1.bf16.msra.mxu0 %v6450_v34  ;;  %v6530_v34 = vld [vmem:[%s7052_s10 + $0x8cc] ss:$16 sps:$4 sm:$0xff]  }
 0x1e2   : > { %4716 = vmatpush1.bf16.msra.mxu1 %v6453_v35  ;;  %4674 = vmatprep.subr.bf16.mxu0 %v6458_v36  ;;  %v6533_v35 = vld [vmem:[%s7052_s10 + $0xacc] ss:$16 sps:$4 sm:$0xff]   ;;  %v6528_v36 = vld [vmem:[%s7052_s10 + $0x8c8] ss:$16 sps:$4 sm:$0xff]  }
 0x1e3   : > { %4717 = vmatprep.subr.bf16.mxu1 %v6461_v37  ;;  %v6531_v37 = vld [vmem:[%s7052_s10 + $0xac8] ss:$16 sps:$4 sm:$0xff]  }
 0x1e5   : > { %4675 = vmatpush1.bf16.msra.mxu0 %v6456_v38  ;;  %v6536_v38 = vld [vmem:[%s7052_s10 + $0x8ac] ss:$16 sps:$4 sm:$0xff]  }
 0x1e6   : > { %4718 = vmatpush1.bf16.msra.mxu1 %v6459_v39  ;;  %4676 = vmatprep.subr.bf16.mxu0 %v6464_v41  ;;  %v6539_v39 = vld [vmem:[%s7052_s10 + $0xaac] ss:$16 sps:$4 sm:$0xff]  }
 0x1e7   : > { %4719 = vmatprep.subr.bf16.mxu1 %v6467_v42  ;;  %v6542_v41 = vld [vmem:[%s7052_s10 + $0x88c] ss:$16 sps:$4 sm:$0xff]  }
 0x1e8   : > { %v6545_v42 = vld [vmem:[%s7052_s10 + $0xa8c] ss:$16 sps:$4 sm:$0xff]  }
 0x1e9   : > { %4677 = vmatpush1.bf16.msra.mxu0 %v6462_v43  ;;  %v7718_v43 = vpop.f32.mrf.mxu0 }
 0x1ea   : > { %4720 = vmatpush1.bf16.msra.mxu1 %v6465_v44  ;;  %4678 = vmatprep.subr.bf16.mxu0 %v6470_v48  ;;  %v7720_v44 = vpop.f32.mrf.mxu1  ;;  %v6548_v48 = vld [vmem:[%s7052_s10 + $0x86c] ss:$16 sps:$4 sm:$0xff]  }
 0x1eb   : > { %4721 = vmatprep.subr.bf16.mxu1 %v6473_v49  ;;  %v6551_v49 = vld [vmem:[%s7052_s10 + $0xa6c] ss:$16 sps:$4 sm:$0xff]  }
 0x1ed   : > { %4679 = vmatpush1.bf16.msra.mxu0 %v6468_v50  ;;  %v7726_v50 = vpop.f32.mrf.mxu0 }
 0x1ee   : > { %4722 = vmatpush1.bf16.msra.mxu1 %v6471_v51  ;;  %4680 = vmatprep.subr.bf16.mxu0 %v6476_v52  ;;  %v7728_v51 = vpop.f32.mrf.mxu1  ;;  %v6546_v52 = vld [vmem:[%s7052_s10 + $0x868] ss:$16 sps:$4 sm:$0xff]  }
 0x1ef   : > { %4723 = vmatprep.subr.bf16.mxu1 %v6479_v55  ;;  %v6549_v55 = vld [vmem:[%s7052_s10 + $0xa68] ss:$16 sps:$4 sm:$0xff]  }
 0x1f1   : > { %4681 = vmatpush2.bf16.msra.mxu0 %v6474_v56  ;;  %v6554_v56 = vld [vmem:[%s7052_s10 + $0x84c] ss:$16 sps:$4 sm:$0xff]  }
 0x1f2   : > { %4724 = vmatpush2.bf16.msra.mxu1 %v6477_v57  ;;  %4682 = vmatprep.subr.bf16.mxu0 %v6482_v62  ;;  %v6557_v57 = vld [vmem:[%s7052_s10 + $0xa4c] ss:$16 sps:$4 sm:$0xff]   ;;  %v7734_v62 = vpop.f32.mrf.mxu0 }
 0x1f3   : > { %4725 = vmatprep.subr.bf16.mxu1 %v6485_v63  ;;  %v7736_v63 = vpop.f32.mrf.mxu1 }
 0x1f5   : > { %4683 = vmatpush2.bf16.msra.mxu0 %v6480_v2  ;;  %v6552_v2 = vld [vmem:[%s7052_s10 + $0x848] ss:$16 sps:$4 sm:$0xff]  }
 0x1f6   : > { %4726 = vmatpush2.bf16.msra.mxu1 %v6483_v3  ;;  %4684 = vmatprep.subr.bf16.mxu0 %v6488_v4  ;;  %v6555_v3 = vld [vmem:[%s7052_s10 + $0xa48] ss:$16 sps:$4 sm:$0xff]   ;;  %v6560_v4 = vld [vmem:[%s7052_s10 + $0x82c] ss:$16 sps:$4 sm:$0xff]  }
 0x1f7   : > { %4727 = vmatprep.subr.bf16.mxu1 %v6491_v5  ;;  %v6563_v5 = vld [vmem:[%s7052_s10 + $0xa2c] ss:$16 sps:$4 sm:$0xff]  }
 0x1f9   : > { %4685 = vmatpush2.bf16.msra.mxu0 %v6486_v6  ;;  %v7742_v6 = vpop.f32.mrf.mxu0 }
 0x1fa   : > { %4728 = vmatpush2.bf16.msra.mxu1 %v6489_v7  ;;  %4686 = vmatprep.subr.bf16.mxu0 %v6494_v8  ;;  %v7744_v7 = vpop.f32.mrf.mxu1  ;;  %v6558_v8 = vld [vmem:[%s7052_s10 + $0x828] ss:$16 sps:$4 sm:$0xff]  }
 0x1fb   : > { %4729 = vmatprep.subr.bf16.mxu1 %v6497_v9  ;;  %v6561_v9 = vld [vmem:[%s7052_s10 + $0xa28] ss:$16 sps:$4 sm:$0xff]  }
 0x1fd   : > { %4687 = vmatpush2.bf16.msra.mxu0 %v6492_v10  ;;  %v7748_v10 = vpop.f32.mrf.mxu0 }
 0x1fe   : > { %4730 = vmatpush2.bf16.msra.mxu1 %v6495_v11  ;;  %4688 = vmatprep.subr.bf16.mxu0 %v6500_v53  ;;  %v7750_v11 = vpop.f32.mrf.mxu1  ;;  %v6566_v53 = vld [vmem:[%s7052_s10 + $0x80c] ss:$16 sps:$4 sm:$0xff]  }
 0x1ff   : > { %4731 = vmatprep.subr.bf16.mxu1 %v6503_v54  ;;  %v6569_v54 = vld [vmem:[%s7052_s10 + $0xa0c] ss:$16 sps:$4 sm:$0xff]  }
 0x201   : > { %4689 = vmatpush2.bf16.msra.mxu0 %v6498_v14  ;;  %v928_v14 = vlaneseq }
 0x202   : > { %4732 = vmatpush2.bf16.msra.mxu1 %v6501_v15  ;;  %4690 = vmatprep.subr.bf16.mxu0 %v6506_v16  ;;  %v6564_v15 = vld [vmem:[%s7052_s10 + $0x808] ss:$16 sps:$4 sm:$0xff]  }
 0x203   : > { %4733 = vmatprep.subr.bf16.mxu1 %v6509_v17  ;;  %v6567_v16 = vld [vmem:[%s7052_s10 + $0xa08] ss:$16 sps:$4 sm:$0xff]   ;;  %v7756_v17 = vpop.f32.mrf.mxu0 }
 0x205   : > { %4691 = vmatpush2.bf16.msra.mxu0 %v6504_v18  ;;  %v7758_v18 = vpop.f32.mrf.mxu1 }
 0x206   : > { %4734 = vmatpush2.bf16.msra.mxu1 %v6507_v19  ;;  %4692 = vmatprep.subr.bf16.mxu0 %v6512_v20  ;;  %v6572_v19 = vld [vmem:[%s7052_s10 + $0x9ec] ss:$16 sps:$4 sm:$0xff]  }
 0x207   : > { %4735 = vmatprep.subr.bf16.mxu1 %v6515_v21  ;;  %v6575_v20 = vld [vmem:[%s7052_s10 + $0xbec] ss:$16 sps:$4 sm:$0xff]   ;;  %v7762_v21 = vshrl.u32 %v928_v14, 7 }
 0x208   : > { %v6602_v14 = vld [vmem:[%s7052_s10 + $0x94c] ss:$16 sps:$4 sm:$0xff]  }
 0x209   : > { %4693 = vmatpush2.bf16.msra.mxu0 %v6510_v24  ;;  %v6570_v24 = vld [vmem:[%s7052_s10 + $0x9e8] ss:$16 sps:$4 sm:$0xff]  }
 0x20a   : > { %4736 = vmatpush2.bf16.msra.mxu1 %v6513_v25  ;;  %4694 = vmatprep.subr.bf16.mxu0 %v6518_v26  ;;  %v6573_v25 = vld [vmem:[%s7052_s10 + $0xbe8] ss:$16 sps:$4 sm:$0xff]   ;;  %v7766_v26 = vpop.f32.mrf.mxu0 }
 0x20b   : > { %4737 = vmatprep.subr.bf16.mxu1 %v6521_v27  ;;  %v7768_v27 = vpop.f32.mrf.mxu1 }
 0x20d   : > { %4695 = vmatpush2.bf16.msra.mxu0 %v6516_v12  ;;  %v6578_v12 = vld [vmem:[%s7052_s10 + $0x9cc] ss:$16 sps:$4 sm:$0xff]  }
 0x20e   : > { %4738 = vmatpush2.bf16.msra.mxu1 %v6519_v13  ;;  %4750 = vmatprep.subr.bf16.mxu0 %v6524_v32  ;;  %v6581_v13 = vld [vmem:[%s7052_s10 + $0xbcc] ss:$16 sps:$4 sm:$0xff]   ;;  %v930_v32 = vsub.s32 0, %v7762_v21 }
 0x20f   : > { %4793 = vmatprep.subr.bf16.mxu1 %v6527_v33  ;;  %v6576_v33 = vld [vmem:[%s7052_s10 + $0x9c8] ss:$16 sps:$4 sm:$0xff]  }
 0x210   : > { %4697 = vmatmul.mubr.bf16.vlgmr.msra.gmra.mxu0 %v7262_v28  ;;  %v6534_v28 = vld [vmem:[%s7052_s10 + $0x8a8] ss:$16 sps:$4 sm:$0xff]  }
 0x211   : > { %4740 = vmatmul.mubr.bf16.vlgmr.msra.gmra.mxu1 %v7264_v29  ;;  %4751 = vmatpush1.bf16.msra.mxu0 %v6522_v45  ;;  %v6537_v29 = vld [vmem:[%s7052_s10 + $0xaa8] ss:$16 sps:$4 sm:$0xff]  }
 0x212   : > { %4794 = vmatpush1.bf16.msra.mxu1 %v6525_v47  ;;  %4752 = vmatprep.subr.bf16.mxu0 %v6530_v34  ;;  %v6579_v45 = vld [vmem:[%s7052_s10 + $0xbc8] ss:$16 sps:$4 sm:$0xff]   ;;  %v7776_v47 = vld [vmem:[%s7060_s9] sm:$0xf]  ;;  %v7778_v34 = vpop.f32.mrf.mxu0  ;;  %s5152_s9 = sshll.u32 %s7048_s30, 6 }
 0x213   : > { %4795 = vmatprep.subr.bf16.mxu1 %v6533_v35  ;;  %4782 = vmatprep.mubr.bf16.mxu0 %v7282_v40  ;;  %v6540_v40 = vld [vmem:[%s7052_s10 + $0x888] ss:$16 sps:$4 sm:$0xff]   ;;  %v7780_v35 = vpop.f32.mrf.mxu1  ;;  %s7846_s30 = scalar_lea.vmem [#allocation6], %s5152_s9 }
 0x214   : > { %4825 = vmatprep.mubr.bf16.mxu1 %v7292_v46  ;;  %v6543_v46 = vld [vmem:[%s7052_s10 + $0xa88] ss:$16 sps:$4 sm:$0xff]  }
 0x215   : > { %4753 = vmatpush1.bf16.msra.mxu0 %v6528_v36  ;;  %v6584_v36 = vld [vmem:[%s7052_s10 + $0x9ac] ss:$16 sps:$4 sm:$0xff]  }
 0x216   : > { %4796 = vmatpush1.bf16.msra.mxu1 %v6531_v37  ;;  %4754 = vmatprep.subr.bf16.mxu0 %v6536_v38  ;;  %v6587_v37 = vld [vmem:[%s7052_s10 + $0xbac] ss:$16 sps:$4 sm:$0xff]   ;;  %v934_v38 = vsub.s32 1, %v7762_v21 }
 0x217   : > { %4797 = vmatprep.subr.bf16.mxu1 %v6539_v39  ;;  %v4354_v39 = vpop.f32.mrf.mxu0 }
 0x219   : > { %4755 = vmatpush1.bf16.msra.mxu0 %v6534_v28  ;;  %v7785_v28 = vpop.f32.mrf.mxu1 }
 0x21a   : > { %4798 = vmatpush1.bf16.msra.mxu1 %v6537_v29  ;;  %4756 = vmatprep.subr.bf16.mxu0 %v6542_v41  ;;  %v931_v29 = vrot.slane %v7776_v47, %v930_v32  ;;  %v6582_v41 = vld [vmem:[%s7052_s10 + $0x9a8] ss:$16 sps:$4 sm:$0xff]  }
 0x21b   : > { %4799 = vmatprep.subr.bf16.mxu1 %v6545_v42  ;;  %v6585_v42 = vld [vmem:[%s7052_s10 + $0xba8] ss:$16 sps:$4 sm:$0xff]  }
 0x21d   : > { %4757 = vmatpush1.bf16.msra.mxu0 %v6540_v40  ;;  %v6590_v40 = vld [vmem:[%s7052_s10 + $0x98c] ss:$16 sps:$4 sm:$0xff]  }
 0x21e   : > { %4800 = vmatpush1.bf16.msra.mxu1 %v6543_v46  ;;  %4758 = vmatprep.subr.bf16.mxu0 %v6548_v48  ;;  %v6593_v46 = vld [vmem:[%s7052_s10 + $0xb8c] ss:$16 sps:$4 sm:$0xff]   ;;  %v935_v48 = vrot.slane %v7776_v47, %v934_v38  ;;  %v6609_v38 = vld [vmem:[%s7052_s10 + $0xb28] ss:$16 sps:$4 sm:$0xff]  }
 0x21f   : > { %4801 = vmatprep.subr.bf16.mxu1 %v6551_v49  ;;  %v4356_v49 = vpop.f32.mrf.mxu0 }
 0x221   : > { %4759 = vmatpush1.bf16.msra.mxu0 %v6546_v52  ;;  %v7793_v52 = vpop.f32.mrf.mxu1 }
 0x222   : > { %4802 = vmatpush1.bf16.msra.mxu1 %v6549_v55  ;;  %4760 = vmatprep.subr.bf16.mxu0 %v6554_v56  ;;  %v4183_v55 = vadd.f32 %v7718_v43, %v931_v29  ;;  %v6588_v56 = vld [vmem:[%s7052_s10 + $0x988] ss:$16 sps:$4 sm:$0xff]   ;;  %v4187_v43 = vadd.f32 %v7734_v62, %v931_v29 }
 0x223   : > { %4803 = vmatprep.subr.bf16.mxu1 %v6557_v57  ;;  %v6591_v57 = vld [vmem:[%s7052_s10 + $0xb88] ss:$16 sps:$4 sm:$0xff]  }
 0x225   : > { %4761 = vmatpush1.bf16.msra.mxu0 %v6552_v2  ;;  %v6596_v2 = vld [vmem:[%s7052_s10 + $0x96c] ss:$16 sps:$4 sm:$0xff]  }
 0x226   : > { %4804 = vmatpush1.bf16.msra.mxu1 %v6555_v3  ;;  %4762 = vmatprep.subr.bf16.mxu0 %v6560_v4  ;;  %v6599_v3 = vld [vmem:[%s7052_s10 + $0xb6c] ss:$16 sps:$4 sm:$0xff]   ;;  %v4185_v4 = vadd.f32 %v7726_v50, %v935_v48  ;;  %v4189_v50 = vadd.f32 %v7742_v6, %v935_v48 }
 0x227   : > { %4805 = vmatprep.subr.bf16.mxu1 %v6563_v5  ;;  %v4358_v5 = vpop.f32.mrf.mxu0  ;;  %v6611_v6 = vld [vmem:[%s7052_s10 + $0xb2c] ss:$16 sps:$4 sm:$0xff]  }
 0x229   : > { %4763 = vmatpush1.bf16.msra.mxu0 %v6558_v8  ;;  %v4401_v8 = vpop.f32.mrf.mxu1 }
 0x22a   : > { %4806 = vmatpush1.bf16.msra.mxu1 %v6561_v9  ;;  %4764 = vmatprep.subr.bf16.mxu0 %v6566_v53  ;;  %v4226_v9 = vadd.f32 %v7720_v44, %v4183_v55  ;;  %v6594_v53 = vld [vmem:[%s7052_s10 + $0x968] ss:$16 sps:$4 sm:$0xff]  }
 0x22b   : > { %4807 = vmatprep.subr.bf16.mxu1 %v6569_v54  ;;  %v6597_v54 = vld [vmem:[%s7052_s10 + $0xb68] ss:$16 sps:$4 sm:$0xff]   ;;  %v4403_v62 = vpop.f32.mrf.mxu1 }
 0x22c   : > { %v4269_v44 = vadd.f32 %v7748_v10, %v4226_v9  ;;  %v4232_v10 = vadd.f32 %v7744_v7, %v4189_v50  ;;  %v6614_v7 = vld [vmem:[%s7052_s10 + $0x90c] ss:$16 sps:$4 sm:$0xff]  }
 0x22d   : > { %4765 = vmatpush1.bf16.msra.mxu0 %v6564_v15  ;;  %v6605_v15 = vld [vmem:[%s7052_s10 + $0xb4c] ss:$16 sps:$4 sm:$0xff]   ;;  %v4483_v32 = vpop.f32.mrf.mxu1 }
 0x22e   : > { %4808 = vmatpush1.bf16.msra.mxu1 %v6567_v16  ;;  %4766 = vmatprep.subr.bf16.mxu0 %v6572_v19  ;;  %v4228_v16 = vadd.f32 %v7728_v51, %v4185_v4  ;;  %v4360_v19 = vpop.f32.mrf.mxu0  ;;  %v6608_v51 = vld [vmem:[%s7052_s10 + $0x92c] ss:$16 sps:$4 sm:$0xff]   ;;  %v6621_v4 = vld [vmem:[%s7052_s10 + $0xee8] ss:$16 sps:$4 sm:$0xff]  }
 0x22f   : > { %4809 = vmatprep.subr.bf16.mxu1 %v6575_v20  ;;  %v4230_v20 = vadd.f32 %v7736_v63, %v4187_v43  ;;  %v4312_v63 = vadd.f32 %v7750_v11, %v4269_v44  ;;  %v6617_v11 = vld [vmem:[%s7052_s10 + $0xb0c] ss:$16 sps:$4 sm:$0xff]  }
 0x230   : > { %v6626_v43 = vld [vmem:[%s7052_s10 + $0xccc] ss:$16 sps:$4 sm:$0xff]  }
 0x231   : > { %4767 = vmatpush2.bf16.msra.mxu0 %v6570_v24  ;;  %v4271_v24 = vadd.f32 %v7756_v17, %v4228_v16  ;;  %v4273_v17 = vadd.f32 %v7766_v26, %v4230_v20  ;;  %v6627_v20 = vld [vmem:[%s7052_s10 + $0xec8] ss:$16 sps:$4 sm:$0xff]  }
 0x232   : > { %4810 = vmatpush2.bf16.msra.mxu1 %v6573_v25  ;;  %4768 = vmatprep.subr.bf16.mxu0 %v6578_v12  ;;  %v6600_v25 = vld [vmem:[%s7052_s10 + $0x948] ss:$16 sps:$4 sm:$0xff]  }
 0x233   : > { %4811 = vmatprep.subr.bf16.mxu1 %v6581_v13  ;;  %v6603_v12 = vld [vmem:[%s7052_s10 + $0xb48] ss:$16 sps:$4 sm:$0xff]   ;;  %v4440_v13 = vpop.f32.mrf.mxu0  ;;  %v4316_v26 = vadd.f32 %v7768_v27, %v4273_v17  ;;  %v6623_v27 = vld [vmem:[%s7052_s10 + $0xeec] ss:$16 sps:$4 sm:$0xff]  }
 0x234   : > { %v6630_v17 = vld [vmem:[%s7052_s10 + $0xca8] ss:$16 sps:$4 sm:$0xff]  }
 0x235   : > { %4769 = vmatpush2.bf16.msra.mxu0 %v6576_v33  ;;  %v4314_v33 = vadd.f32 %v7758_v18, %v4271_v24  ;;  %v4442_v29 = vpop.f32.mrf.mxu0 }
 0x236   : > { %4812 = vmatpush2.bf16.msra.mxu1 %v6579_v45  ;;  %4770 = vmatprep.subr.bf16.mxu0 %v6584_v36  ;;  %v4275_v45 = vadd.f32 %v7778_v34, %v4232_v10  ;;  %v4355_v36 = vadd.f32 %v4354_v39, %v4312_v63 }
 0x237   : > { %4813 = vmatprep.subr.bf16.mxu1 %v6587_v37  ;;  %v6606_v37 = vld [vmem:[%s7052_s10 + $0x928] ss:$16 sps:$4 sm:$0xff]   ;;  %v4357_v18 = vadd.f32 %v4356_v49, %v4314_v33  ;;  %v4444_v48 = vpop.f32.mrf.mxu0 }
 0x238   : > { %v4318_v34 = vadd.f32 %v7780_v35, %v4275_v45  ;;  %v4398_v39 = vadd.f32 %v7785_v28, %v4355_v36  ;;  %v6641_v45 = vld [vmem:[%s7052_s10 + $0xe8c] ss:$16 sps:$4 sm:$0xff]  }
 0x239   : > { %4771 = vmatpush2.bf16.msra.mxu0 %v6582_v41  ;;  %v4485_v41 = vpop.f32.mrf.mxu1  ;;  %v4400_v49 = vadd.f32 %v7793_v52, %v4357_v18  ;;  %v6642_v18 = vld [vmem:[%s7052_s10 + $0xc68] ss:$16 sps:$4 sm:$0xff]  }
 0x23a   : > { %4814 = vmatpush2.bf16.msra.mxu1 %v6585_v42  ;;  %4772 = vmatprep.subr.bf16.mxu0 %v6590_v40  ;;  %v4359_v42 = vadd.f32 %v4358_v5, %v4316_v26  ;;  %v6612_v40 = vld [vmem:[%s7052_s10 + $0x908] ss:$16 sps:$4 sm:$0xff]   ;;  %v4361_v35 = vadd.f32 %v4360_v19, %v4318_v34  ;;  %v4446_v5 = vpop.f32.mrf.mxu0  ;;  %v6647_v26 = vld [vmem:[%s7052_s10 + $0xe6c] ss:$16 sps:$4 sm:$0xff]  }
 0x23b   : > { %4815 = vmatprep.subr.bf16.mxu1 %v6593_v46  ;;  %v6615_v46 = vld [vmem:[%s7052_s10 + $0xb08] ss:$16 sps:$4 sm:$0xff]   ;;  %v4487_v55 = vpop.f32.mrf.mxu1 }
 0x23c   : > { %v4402_v28 = vadd.f32 %v4401_v8, %v4359_v42  ;;  %v6624_v19 = vld [vmem:[%s7052_s10 + $0xcc8] ss:$16 sps:$4 sm:$0xff]   ;;  %v6653_v42 = vld [vmem:[%s7052_s10 + $0xe4c] ss:$16 sps:$4 sm:$0xff]  }
 0x23d   : > { %4773 = vmatpush2.bf16.msra.mxu0 %v6588_v56  ;;  %v6620_v56 = vld [vmem:[%s7052_s10 + $0xcec] ss:$16 sps:$4 sm:$0xff]   ;;  %v4489_v9 = vpop.f32.mrf.mxu1  ;;  %v6645_v34 = vld [vmem:[%s7052_s10 + $0xe68] ss:$16 sps:$4 sm:$0xff]  }
 0x23e   : > { %4816 = vmatpush2.bf16.msra.mxu1 %v6591_v57  ;;  %4774 = vmatprep.subr.bf16.mxu0 %v6596_v2  ;;  %v4441_v57 = vadd.f32 %v4440_v13, %v4398_v39  ;;  %v4443_v2 = vadd.f32 %v4442_v29, %v4400_v49  ;;  %v4445_v52 = vadd.f32 %v4444_v48, %v4402_v28  ;;  %v6650_v39 = vld [vmem:[%s7052_s10 + $0xc4c] ss:$16 sps:$4 sm:$0xff]   ;;  %v6663_v28 = vld [vmem:[%s7052_s10 + $0xe08] ss:$16 sps:$4 sm:$0xff]  }
 0x23f   : > { %4817 = vmatprep.subr.bf16.mxu1 %v6599_v3  ;;  %v6618_v3 = vld [vmem:[%s7052_s10 + $0xce8] ss:$16 sps:$4 sm:$0xff]   ;;  %v6656_v48 = vld [vmem:[%s7052_s10 + $0xc2c] ss:$16 sps:$4 sm:$0xff]  }
 0x240   : > { %v4486_v16 = vadd.f32 %v4485_v41, %v4443_v2  ;;  %v4488_v13 = vadd.f32 %v4487_v55, %v4445_v52  ;;  %v6636_v41 = vld [vmem:[%s7052_s10 + $0xc88] ss:$16 sps:$4 sm:$0xff]   ;;  %v6659_v55 = vld [vmem:[%s7052_s10 + $0xe2c] ss:$16 sps:$4 sm:$0xff]  }
 0x241   : > { %4775 = vmatpush2.bf16.msra.mxu0 %v6594_v53  ;;  %v6629_v53 = vld [vmem:[%s7052_s10 + $0xecc] ss:$16 sps:$4 sm:$0xff]  }
 0x242   : > { %4818 = vmatpush2.bf16.msra.mxu1 %v6597_v54  ;;  %4776 = vmatprep.subr.bf16.mxu0 %v6602_v14  ;;  %v4404_v54 = vadd.f32 %v4403_v62, %v4361_v35  ;;  %v4484_v14 = vadd.f32 %v4483_v32, %v4441_v57  ;;  %v6662_v49 = vld [vmem:[%s7052_s10 + $0xc0c] ss:$16 sps:$4 sm:$0xff]   ;;  %v6660_v57 = vld [vmem:[%s7052_s10 + $0xc08] ss:$16 sps:$4 sm:$0xff]  }
 0x243   : > { %4819 = vmatprep.subr.bf16.mxu1 %v6605_v15  ;;  %v6665_v35 = vld [vmem:[%s7052_s10 + $0xe0c] ss:$16 sps:$4 sm:$0xff]  }
 0x244   : > { %v4447_v50 = vadd.f32 %v4446_v5, %v4404_v54  ;;  %v6668_v2 = vld [vmem:[%s7052_s10 + $0xdec] ss:$16 sps:$4 sm:$0xff]   ;;  %v6669_v5 = vld [vmem:[%s7052_s10 + $0xfe8] ss:$16 sps:$4 sm:$0xff]  }
 0x245   : > { %4777 = vmatpush2.bf16.msra.mxu0 %v6600_v25  ;;  %v6632_v25 = vld [vmem:[%s7052_s10 + $0xcac] ss:$16 sps:$4 sm:$0xff]   ;;  %v6675_v54 = vld [vmem:[%s7052_s10 + $0xfc8] ss:$16 sps:$4 sm:$0xff]  }
 0x246   : > { %4820 = vmatpush2.bf16.msra.mxu1 %v6603_v12  ;;  %4778 = vmatprep.subr.bf16.mxu0 %v6608_v51  ;;  %v6635_v12 = vld [vmem:[%s7052_s10 + $0xeac] ss:$16 sps:$4 sm:$0xff]  }
 0x247   : > { %4821 = vmatprep.subr.bf16.mxu1 %v6611_v6  ;;  %v4490_v6 = vadd.f32 %v4489_v9, %v4447_v50  ;;  %v6674_v9 = vld [vmem:[%s7052_s10 + $0xdcc] ss:$16 sps:$4 sm:$0xff]  }
 0x248   : > { %v6683_v52 = vld [vmem:[%s7052_s10 + $0xfac] ss:$16 sps:$4 sm:$0xff]  }
 0x249   : > { %4779 = vmatpush2.bf16.msra.mxu0 %v6606_v37  ;;  %v6689_v50 = vld [vmem:[%s7052_s10 + $0xf8c] ss:$16 sps:$4 sm:$0xff]  }
 0x24a   : > { %4822 = vmatpush2.bf16.msra.mxu1 %v6609_v38  ;;  %4780 = vmatprep.subr.bf16.mxu0 %v6614_v7  ;;  %v6639_v7 = vld [vmem:[%s7052_s10 + $0xe88] ss:$16 sps:$4 sm:$0xff]  }
 0x24b   : > { %4823 = vmatprep.subr.bf16.mxu1 %v6617_v11  ;;  %v6644_v11 = vld [vmem:[%s7052_s10 + $0xc6c] ss:$16 sps:$4 sm:$0xff]  }
 0x24d   : > { %4781 = vmatpush2.bf16.msra.mxu0 %v6612_v40  ;;  %v6648_v40 = vld [vmem:[%s7052_s10 + $0xc48] ss:$16 sps:$4 sm:$0xff]  }
 0x24e   : > { %4824 = vmatpush2.bf16.msra.mxu1 %v6615_v46  ;;  %4836 = vmatprep.subr.bf16.mxu0 %v6620_v56  ;;  %v6651_v46 = vld [vmem:[%s7052_s10 + $0xe48] ss:$16 sps:$4 sm:$0xff]  }
 0x24f   : > { %4879 = vmatprep.subr.bf16.mxu1 %v6623_v27  ;;  %v6654_v56 = vld [vmem:[%s7052_s10 + $0xc28] ss:$16 sps:$4 sm:$0xff]  }
 0x250   : > { %v4526_v15 = vpop.f32.mrf.mxu0  ;;  %4783 = vmatmul.mubr.bf16.vlgmr.msra.gmra.mxu0 %v7372_v58  ;;  %v6657_v27 = vld [vmem:[%s7052_s10 + $0xe28] ss:$16 sps:$4 sm:$0xff]  }
 0x251   : > { %v4569_v8 = vpop.f32.mrf.mxu1  ;;  %4826 = vmatmul.mubr.bf16.vlgmr.msra.gmra.mxu1 %v7374_v59  ;;  %v4527_v44 = vadd.f32 %v4526_v15, %v4484_v14  ;;  %4837 = vmatpush1.bf16.msra.mxu0 %v6618_v3  ;;  %v6671_v3 = vld [vmem:[%s7052_s10 + $0xfec] ss:$16 sps:$4 sm:$0xff]   ;;  %v6678_v15 = vld [vmem:[%s7052_s10 + $0xda8] ss:$16 sps:$4 sm:$0xff]  }
 0x252   : > { %4880 = vmatpush1.bf16.msra.mxu1 %v6621_v4  ;;  %v4528_v24 = vpop.f32.mrf.mxu0  ;;  %4838 = vmatprep.subr.bf16.mxu0 %v6626_v43  ;;  %v6666_v4 = vld [vmem:[%s7052_s10 + $0xde8] ss:$16 sps:$4 sm:$0xff]   ;;  %v6677_v43 = vld [vmem:[%s7052_s10 + $0xfcc] ss:$16 sps:$4 sm:$0xff]  }
 0x253   : > { %v4571_v62 = vpop.f32.mrf.mxu1  ;;  %4881 = vmatprep.subr.bf16.mxu1 %v6629_v53  ;;  %v4570_v32 = vadd.f32 %v4569_v8, %v4527_v44  ;;  %v4529_v58 = vadd.f32 %v4528_v24, %v4486_v16  ;;  %4868 = vmatprep.mubr.bf16.mxu0 %v7382_v0  ;;  %v6633_v0 = vld [vmem:[%s7052_s10 + $0xea8] ss:$16 sps:$4 sm:$0xff]   ;;  %v6680_v14 = vld [vmem:[%s7052_s10 + $0xdac] ss:$16 sps:$4 sm:$0xff]  }
 0x254   : > { %4911 = vmatprep.mubr.bf16.mxu1 %v7384_v1  ;;  %v4530_v59 = vpop.f32.mrf.mxu0  ;;  %v6638_v1 = vld [vmem:[%s7052_s10 + $0xc8c] ss:$16 sps:$4 sm:$0xff]   ;;  %v6672_v53 = vld [vmem:[%s7052_s10 + $0xdc8] ss:$16 sps:$4 sm:$0xff]  }
 0x255   : > { %v4573_v51 = vpop.f32.mrf.mxu1  ;;  %5008 = vst [vmem:[%s7846_s30] sm:$0xff] %v4570_v32  ;;  %v4572_v10 = vadd.f32 %v4571_v62, %v4529_v58  ;;  %v4531_v63 = vadd.f32 %v4530_v59, %v4488_v13  ;;  %4839 = vmatpush1.bf16.msra.mxu0 %v6624_v19  ;;  %v6681_v8 = vld [vmem:[%s7052_s10 + $0xfa8] ss:$16 sps:$4 sm:$0xff]   ;;  %v6686_v16 = vld [vmem:[%s7052_s10 + $0xd8c] ss:$16 sps:$4 sm:$0xff]  }
 0x256   : > { %4882 = vmatpush1.bf16.msra.mxu1 %v6627_v20  ;;  %v4532_v33 = vpop.f32.mrf.mxu0  ;;  %4840 = vmatprep.subr.bf16.mxu0 %v6632_v25  ;;  %v6684_v44 = vld [vmem:[%s7052_s10 + $0xd88] ss:$16 sps:$4 sm:$0xff]   ;;  %v6692_v20 = vld [vmem:[%s7052_s10 + $0xd6c] ss:$16 sps:$4 sm:$0xff]  }
 0x257   : > { %4883 = vmatprep.subr.bf16.mxu1 %v6635_v12  ;;  %5009 = vst [vmem:[%s7846_s30 + $0x8] sm:$0xff] %v4572_v10  ;;  %v4574_v36 = vadd.f32 %v4573_v51, %v4531_v63  ;;  %v4533_v37 = vadd.f32 %v4532_v33, %v4490_v6  ;;  %v4575_v38 = vpop.f32.mrf.mxu1  ;;  %v6687_v19 = vld [vmem:[%s7052_s10 + $0xf88] ss:$16 sps:$4 sm:$0xff]   ;;  %v6695_v24 = vld [vmem:[%s7052_s10 + $0xf6c] ss:$16 sps:$4 sm:$0xff]  }
 0x258   : > { %v6690_v62 = vld [vmem:[%s7052_s10 + $0xd68] ss:$16 sps:$4 sm:$0xff]   ;;  %v6698_v12 = vld [vmem:[%s7052_s10 + $0xd4c] ss:$16 sps:$4 sm:$0xff]  }
 0x259   : > { %5012 = vst [vmem:[%s7846_s30 + $0x20] sm:$0xff] %v4574_v36  ;;  %v4576_v29 = vadd.f32 %v4575_v38, %v4533_v37  ;;  %4841 = vmatpush1.bf16.msra.mxu0 %v6630_v17  ;;  %v6693_v25 = vld [vmem:[%s7052_s10 + $0xf68] ss:$16 sps:$4 sm:$0xff]   ;;  %v6701_v13 = vld [vmem:[%s7052_s10 + $0xf4c] ss:$16 sps:$4 sm:$0xff]  }
 0x25a   : > { %4884 = vmatpush1.bf16.msra.mxu1 %v6633_v0  ;;  %4842 = vmatprep.subr.bf16.mxu0 %v6638_v1  ;;  %v6696_v32 = vld [vmem:[%s7052_s10 + $0xd48] ss:$16 sps:$4 sm:$0xff]   ;;  %v6704_v59 = vld [vmem:[%s7052_s10 + $0xd2c] ss:$16 sps:$4 sm:$0xff]  }
 0x25b   : > { %4885 = vmatprep.subr.bf16.mxu1 %v6641_v45  ;;  %5013 = vst [vmem:[%s7846_s30 + $0x28] sm:$0xff] %v4576_v29  ;;  %v6699_v58 = vld [vmem:[%s7052_s10 + $0xf48] ss:$16 sps:$4 sm:$0xff]   ;;  %v6707_v51 = vld [vmem:[%s7052_s10 + $0xf2c] ss:$16 sps:$4 sm:$0xff]  }
 0x25c   : > { %v6702_v6 = vld [vmem:[%s7052_s10 + $0xd28] ss:$16 sps:$4 sm:$0xff]   ;;  %v6710_v63 = vld [vmem:[%s7052_s10 + $0xd0c] ss:$16 sps:$4 sm:$0xff]  }
 0x25d   : > { %4843 = vmatpush1.bf16.msra.mxu0 %v6636_v41  ;;  %v6705_v10 = vld [vmem:[%s7052_s10 + $0xf28] ss:$16 sps:$4 sm:$0xff]   ;;  %v6713_v17 = vld [vmem:[%s7052_s10 + $0xf0c] ss:$16 sps:$4 sm:$0xff]  }
 0x25e   : > { %4886 = vmatpush1.bf16.msra.mxu1 %v6639_v7  ;;  %4844 = vmatprep.subr.bf16.mxu0 %v6644_v11  ;;  %v6708_v0 = vld [vmem:[%s7052_s10 + $0xd08] ss:$16 sps:$4 sm:$0xff]   ;;  %v6716_v1 = vld [vmem:[%s7052_s10 + $0x10ec] ss:$16 sps:$4 sm:$0xff]  }
 0x25f   : > { %4887 = vmatprep.subr.bf16.mxu1 %v6647_v26  ;;  %v6711_v33 = vld [vmem:[%s7052_s10 + $0xf08] ss:$16 sps:$4 sm:$0xff]   ;;  %v6719_v45 = vld [vmem:[%s7052_s10 + $0x12ec] ss:$16 sps:$4 sm:$0xff]  }
 0x260   : > { %v6714_v36 = vld [vmem:[%s7052_s10 + $0x10e8] ss:$16 sps:$4 sm:$0xff]   ;;  %v6722_v38 = vld [vmem:[%s7052_s10 + $0x10cc] ss:$16 sps:$4 sm:$0xff]  }
 0x261   : > { %4845 = vmatpush1.bf16.msra.mxu0 %v6642_v18  ;;  %v6717_v37 = vld [vmem:[%s7052_s10 + $0x12e8] ss:$16 sps:$4 sm:$0xff]   ;;  %v6725_v29 = vld [vmem:[%s7052_s10 + $0x12cc] ss:$16 sps:$4 sm:$0xff]  }
 0x262   : > { %4888 = vmatpush1.bf16.msra.mxu1 %v6645_v34  ;;  %4846 = vmatprep.subr.bf16.mxu0 %v6650_v39  ;;  %v6720_v41 = vld [vmem:[%s7052_s10 + $0x10c8] ss:$16 sps:$4 sm:$0xff]   ;;  %v6728_v11 = vld [vmem:[%s7052_s10 + $0x10ac] ss:$16 sps:$4 sm:$0xff]  }
 0x263   : > { %4889 = vmatprep.subr.bf16.mxu1 %v6653_v42  ;;  %v6723_v7 = vld [vmem:[%s7052_s10 + $0x12c8] ss:$16 sps:$4 sm:$0xff]   ;;  %v6731_v26 = vld [vmem:[%s7052_s10 + $0x12ac] ss:$16 sps:$4 sm:$0xff]  }
 0x264   : > { %v6734_v18 = vld [vmem:[%s7052_s10 + $0x108c] ss:$16 sps:$4 sm:$0xff]   ;;  %v6732_v39 = vld [vmem:[%s7052_s10 + $0x1088] ss:$16 sps:$4 sm:$0xff]  }
 0x265   : > { %4847 = vmatpush1.bf16.msra.mxu0 %v6648_v40  ;;  %v6737_v34 = vld [vmem:[%s7052_s10 + $0x128c] ss:$16 sps:$4 sm:$0xff]   ;;  %v6738_v40 = vld [vmem:[%s7052_s10 + $0x1068] ss:$16 sps:$4 sm:$0xff]  }
 0x266   : > { %4890 = vmatpush1.bf16.msra.mxu1 %v6651_v46  ;;  %4848 = vmatprep.subr.bf16.mxu0 %v6656_v48  ;;  %v6743_v42 = vld [vmem:[%s7052_s10 + $0x126c] ss:$16 sps:$4 sm:$0xff]   ;;  %v6741_v46 = vld [vmem:[%s7052_s10 + $0x1268] ss:$16 sps:$4 sm:$0xff]  }
 0x267   : > { %4891 = vmatprep.subr.bf16.mxu1 %v6659_v55  ;;  %v6746_v48 = vld [vmem:[%s7052_s10 + $0x104c] ss:$16 sps:$4 sm:$0xff]  }
 0x268   : > { %v6749_v55 = vld [vmem:[%s7052_s10 + $0x124c] ss:$16 sps:$4 sm:$0xff]  }
 0x269   : > { %4849 = vmatpush1.bf16.msra.mxu0 %v6654_v56  ;;  %v6744_v56 = vld [vmem:[%s7052_s10 + $0x1048] ss:$16 sps:$4 sm:$0xff]  }
 0x26a   : > { %4892 = vmatpush1.bf16.msra.mxu1 %v6657_v27  ;;  %4850 = vmatprep.subr.bf16.mxu0 %v6662_v49  ;;  %v6747_v27 = vld [vmem:[%s7052_s10 + $0x1248] ss:$16 sps:$4 sm:$0xff]   ;;  %v6752_v49 = vld [vmem:[%s7052_s10 + $0x102c] ss:$16 sps:$4 sm:$0xff]  }
 0x26b   : > { %4893 = vmatprep.subr.bf16.mxu1 %v6665_v35  ;;  %v6755_v35 = vld [vmem:[%s7052_s10 + $0x122c] ss:$16 sps:$4 sm:$0xff]  }
 0x26d   : > { %4851 = vmatpush1.bf16.msra.mxu0 %v6660_v57  ;;  %v6750_v57 = vld [vmem:[%s7052_s10 + $0x1028] ss:$16 sps:$4 sm:$0xff]  }
 0x26e   : > { %4894 = vmatpush1.bf16.msra.mxu1 %v6663_v28  ;;  %4852 = vmatprep.subr.bf16.mxu0 %v6668_v2  ;;  %v6753_v28 = vld [vmem:[%s7052_s10 + $0x1228] ss:$16 sps:$4 sm:$0xff]   ;;  %v6758_v2 = vld [vmem:[%s7052_s10 + $0x100c] ss:$16 sps:$4 sm:$0xff]  }
 0x26f   : > { %4895 = vmatprep.subr.bf16.mxu1 %v6671_v3  ;;  %v6761_v3 = vld [vmem:[%s7052_s10 + $0x120c] ss:$16 sps:$4 sm:$0xff]  }
 0x271   : > { %4853 = vmatpush2.bf16.msra.mxu0 %v6666_v4  ;;  %v6756_v4 = vld [vmem:[%s7052_s10 + $0x1008] ss:$16 sps:$4 sm:$0xff]  }
 0x272   : > { %4896 = vmatpush2.bf16.msra.mxu1 %v6669_v5  ;;  %4854 = vmatprep.subr.bf16.mxu0 %v6674_v9  ;;  %v6759_v5 = vld [vmem:[%s7052_s10 + $0x1208] ss:$16 sps:$4 sm:$0xff]   ;;  %v6764_v9 = vld [vmem:[%s7052_s10 + $0x11ec] ss:$16 sps:$4 sm:$0xff]  }
 0x273   : > { %4897 = vmatprep.subr.bf16.mxu1 %v6677_v43  ;;  %v6767_v43 = vld [vmem:[%s7052_s10 + $0x13ec] ss:$16 sps:$4 sm:$0xff]  }
 0x275   : > { %4855 = vmatpush2.bf16.msra.mxu0 %v6672_v53  ;;  %v6762_v53 = vld [vmem:[%s7052_s10 + $0x11e8] ss:$16 sps:$4 sm:$0xff]  }
 0x276   : > { %4898 = vmatpush2.bf16.msra.mxu1 %v6675_v54  ;;  %4856 = vmatprep.subr.bf16.mxu0 %v6680_v14  ;;  %v6765_v54 = vld [vmem:[%s7052_s10 + $0x13e8] ss:$16 sps:$4 sm:$0xff]   ;;  %v6770_v14 = vld [vmem:[%s7052_s10 + $0x11cc] ss:$16 sps:$4 sm:$0xff]  }
 0x277   : > { %4899 = vmatprep.subr.bf16.mxu1 %v6683_v52  ;;  %v6773_v52 = vld [vmem:[%s7052_s10 + $0x13cc] ss:$16 sps:$4 sm:$0xff]  }
 0x279   : > { %4857 = vmatpush2.bf16.msra.mxu0 %v6678_v15  ;;  %v6768_v15 = vld [vmem:[%s7052_s10 + $0x11c8] ss:$16 sps:$4 sm:$0xff]  }
 0x27a   : > { %4900 = vmatpush2.bf16.msra.mxu1 %v6681_v8  ;;  %4858 = vmatprep.subr.bf16.mxu0 %v6686_v16  ;;  %v6771_v8 = vld [vmem:[%s7052_s10 + $0x13c8] ss:$16 sps:$4 sm:$0xff]   ;;  %v6776_v16 = vld [vmem:[%s7052_s10 + $0x11ac] ss:$16 sps:$4 sm:$0xff]  }
 0x27b   : > { %4901 = vmatprep.subr.bf16.mxu1 %v6689_v50  ;;  %v6779_v50 = vld [vmem:[%s7052_s10 + $0x13ac] ss:$16 sps:$4 sm:$0xff]  }
 0x27d   : > { %4859 = vmatpush2.bf16.msra.mxu0 %v6684_v44  ;;  %v6774_v44 = vld [vmem:[%s7052_s10 + $0x11a8] ss:$16 sps:$4 sm:$0xff]  }
 0x27e   : > { %4902 = vmatpush2.bf16.msra.mxu1 %v6687_v19  ;;  %4860 = vmatprep.subr.bf16.mxu0 %v6692_v20  ;;  %v6777_v19 = vld [vmem:[%s7052_s10 + $0x13a8] ss:$16 sps:$4 sm:$0xff]   ;;  %v6782_v20 = vld [vmem:[%s7052_s10 + $0x118c] ss:$16 sps:$4 sm:$0xff]  }
 0x27f   : > { %4903 = vmatprep.subr.bf16.mxu1 %v6695_v24  ;;  %v6785_v24 = vld [vmem:[%s7052_s10 + $0x138c] ss:$16 sps:$4 sm:$0xff]  }
 0x281   : > { %4861 = vmatpush2.bf16.msra.mxu0 %v6690_v62  ;;  %v6780_v62 = vld [vmem:[%s7052_s10 + $0x1188] ss:$16 sps:$4 sm:$0xff]  }
 0x282   : > { %4904 = vmatpush2.bf16.msra.mxu1 %v6693_v25  ;;  %4862 = vmatprep.subr.bf16.mxu0 %v6698_v12  ;;  %v6783_v25 = vld [vmem:[%s7052_s10 + $0x1388] ss:$16 sps:$4 sm:$0xff]   ;;  %v6788_v12 = vld [vmem:[%s7052_s10 + $0x116c] ss:$16 sps:$4 sm:$0xff]  }
 0x283   : > { %4905 = vmatprep.subr.bf16.mxu1 %v6701_v13  ;;  %v6791_v13 = vld [vmem:[%s7052_s10 + $0x136c] ss:$16 sps:$4 sm:$0xff]  }
 0x285   : > { %4863 = vmatpush2.bf16.msra.mxu0 %v6696_v32  ;;  %v6786_v32 = vld [vmem:[%s7052_s10 + $0x1168] ss:$16 sps:$4 sm:$0xff]  }
 0x286   : > { %4906 = vmatpush2.bf16.msra.mxu1 %v6699_v58  ;;  %4864 = vmatprep.subr.bf16.mxu0 %v6704_v59  ;;  %v6789_v58 = vld [vmem:[%s7052_s10 + $0x1368] ss:$16 sps:$4 sm:$0xff]   ;;  %v6794_v59 = vld [vmem:[%s7052_s10 + $0x114c] ss:$16 sps:$4 sm:$0xff]  }
 0x287   : > { %4907 = vmatprep.subr.bf16.mxu1 %v6707_v51  ;;  %v6797_v51 = vld [vmem:[%s7052_s10 + $0x134c] ss:$16 sps:$4 sm:$0xff]  }
 0x289   : > { %4865 = vmatpush2.bf16.msra.mxu0 %v6702_v6  ;;  %v6792_v6 = vld [vmem:[%s7052_s10 + $0x1148] ss:$16 sps:$4 sm:$0xff]  }
 0x28a   : > { %4908 = vmatpush2.bf16.msra.mxu1 %v6705_v10  ;;  %4866 = vmatprep.subr.bf16.mxu0 %v6710_v63  ;;  %v6795_v10 = vld [vmem:[%s7052_s10 + $0x1348] ss:$16 sps:$4 sm:$0xff]   ;;  %v6800_v63 = vld [vmem:[%s7052_s10 + $0x112c] ss:$16 sps:$4 sm:$0xff]  }
 0x28b   : > { %4909 = vmatprep.subr.bf16.mxu1 %v6713_v17  ;;  %v6803_v17 = vld [vmem:[%s7052_s10 + $0x132c] ss:$16 sps:$4 sm:$0xff]  }
 0x28d   : > { %4867 = vmatpush2.bf16.msra.mxu0 %v6708_v0  ;;  %v6798_v0 = vld [vmem:[%s7052_s10 + $0x1128] ss:$16 sps:$4 sm:$0xff]  }
 0x28e   : > { %4910 = vmatpush2.bf16.msra.mxu1 %v6711_v33  ;;  %4922 = vmatprep.subr.bf16.mxu0 %v6716_v1  ;;  %v6801_v33 = vld [vmem:[%s7052_s10 + $0x1328] ss:$16 sps:$4 sm:$0xff]   ;;  %v6806_v1 = vld [vmem:[%s7052_s10 + $0x110c] ss:$16 sps:$4 sm:$0xff]  }
 0x28f   : > { %4965 = vmatprep.subr.bf16.mxu1 %v6719_v45  ;;  %v6809_v45 = vld [vmem:[%s7052_s10 + $0x130c] ss:$16 sps:$4 sm:$0xff]  }
 0x290   : > { %4869 = vmatmul.mubr.bf16.vlgmr.msra.gmra.mxu0 %v7472_v22  ;;  %v6726_v22 = vld [vmem:[%s7052_s10 + $0x10a8] ss:$16 sps:$4 sm:$0xff]  }
 0x291   : > { %4912 = vmatmul.mubr.bf16.vlgmr.msra.gmra.mxu1 %v7474_v23  ;;  %4923 = vmatpush1.bf16.msra.mxu0 %v6714_v36  ;;  %v6729_v23 = vld [vmem:[%s7052_s10 + $0x12a8] ss:$16 sps:$4 sm:$0xff]  }
 0x292   : > { %4966 = vmatpush1.bf16.msra.mxu1 %v6717_v37  ;;  %4924 = vmatprep.subr.bf16.mxu0 %v6722_v38  ;;  %v6804_v36 = vld [vmem:[%s7052_s10 + $0x1108] ss:$16 sps:$4 sm:$0xff]   ;;  %v4612_v38 = vpop.f32.mrf.mxu0 }
 0x293   : > { %4967 = vmatprep.subr.bf16.mxu1 %v6725_v29  ;;  %4954 = vmatprep.mubr.bf16.mxu0 %v7482_v30  ;;  %v6735_v30 = vld [vmem:[%s7052_s10 + $0x1288] ss:$16 sps:$4 sm:$0xff]   ;;  %v4655_v29 = vpop.f32.mrf.mxu1 }
 0x294   : > { %4997 = vmatprep.mubr.bf16.mxu1 %v7484_v31  ;;  %v6740_v31 = vld [vmem:[%s7052_s10 + $0x106c] ss:$16 sps:$4 sm:$0xff]   ;;  %v6807_v37 = vld [vmem:[%s7052_s10 + $0x1308] ss:$16 sps:$4 sm:$0xff]   ;;  %s5800_s10 = sshll.u32 (%p8022_p7), %s6950_s16, 5 }
 0x295   : > { %4925 = vmatpush1.bf16.msra.mxu0 %v6720_v41  ;;  %v4614_v41 = vpop.f32.mrf.mxu0  ;;  %s5025_s25 = scalar_lea.vmem (%p8022_p7), %s8014_s3, %s5800_s10 }
 0x296   : > { %4968 = vmatpush1.bf16.msra.mxu1 %v6723_v7  ;;  %4926 = vmatprep.subr.bf16.mxu0 %v6728_v11  ;;  %v4657_v7 = vpop.f32.mrf.mxu1 }
 0x297   : > { %4969 = vmatprep.subr.bf16.mxu1 %v6731_v26  ;;  %v4616_v11 = vpop.f32.mrf.mxu0 }
 0x298   : > { %v4659_v26 = vpop.f32.mrf.mxu1 }
 0x299   : > { %4927 = vmatpush1.bf16.msra.mxu0 %v6726_v22  ;;  %v4618_v22 = vpop.f32.mrf.mxu0 }
 0x29a   : > { %4970 = vmatpush1.bf16.msra.mxu1 %v6729_v23  ;;  %4928 = vmatprep.subr.bf16.mxu0 %v6734_v18  ;;  %v4661_v23 = vpop.f32.mrf.mxu1 }
 0x29b   : > { %4971 = vmatprep.subr.bf16.mxu1 %v6737_v34 }
 0x29d   : > { %4929 = vmatpush1.bf16.msra.mxu0 %v6732_v39 }
 0x29e   : > { %4972 = vmatpush1.bf16.msra.mxu1 %v6735_v30  ;;  %4930 = vmatprep.subr.bf16.mxu0 %v6740_v31 }
 0x29f   : > { %4973 = vmatprep.subr.bf16.mxu1 %v6743_v42 }
 0x2a1   : > { %4931 = vmatpush1.bf16.msra.mxu0 %v6738_v40  ;;  %v938_v40 = vsub.s32 2, %v7762_v21 }
 0x2a2   : > { %4974 = vmatpush1.bf16.msra.mxu1 %v6741_v46  ;;  %4932 = vmatprep.subr.bf16.mxu0 %v6746_v48 }
 0x2a3   : > { %4975 = vmatprep.subr.bf16.mxu1 %v6749_v55 }
 0x2a5   : > { %4933 = vmatpush1.bf16.msra.mxu0 %v6744_v56  ;;  %v939_v56 = vrot.slane %v7776_v47, %v938_v40 }
 0x2a6   : > { %4976 = vmatpush1.bf16.msra.mxu1 %v6747_v27  ;;  %4934 = vmatprep.subr.bf16.mxu0 %v6752_v49 }
 0x2a7   : > { %4977 = vmatprep.subr.bf16.mxu1 %v6755_v35 }
 0x2a9   : > { %4935 = vmatpush1.bf16.msra.mxu0 %v6750_v57  ;;  %v4613_v57 = vadd.f32 %v4612_v38, %v939_v56 }
 0x2aa   : > { %4978 = vmatpush1.bf16.msra.mxu1 %v6753_v28  ;;  %4936 = vmatprep.subr.bf16.mxu0 %v6758_v2 }
 0x2ab   : > { %4979 = vmatprep.subr.bf16.mxu1 %v6761_v3 }
 0x2ad   : > { %4937 = vmatpush1.bf16.msra.mxu0 %v6756_v4  ;;  %v4656_v4 = vadd.f32 %v4655_v29, %v4613_v57  ;;  %v5046_v57 = vld [vmem:[%s7846_s30 + $0x20] sm:$0xff] (%p8022_p7) }
 0x2ae   : > { %4980 = vmatpush1.bf16.msra.mxu1 %v6759_v5  ;;  %4938 = vmatprep.subr.bf16.mxu0 %v6764_v9  ;;  %v4617_v5 = vadd.f32 %v4616_v11, %v939_v56  ;;  %v5038_v56 = vld [vmem:[%s7846_s30] sm:$0xff] (%p8022_p7)  ;;  %5047 = vst [vmem:[%s5025_s25 + $0x40] sm:$0xff] (%p8022_p7), %v5046_v57 }
 0x2af   : > { %4981 = vmatprep.subr.bf16.mxu1 %v6767_v43  ;;  %5039 = vst [vmem:[%s5025_s25] sm:$0xff] (%p8022_p7), %v5038_v56 }
 0x2b1   : > { %4939 = vmatpush2.bf16.msra.mxu0 %v6762_v53 }
 0x2b2   : > { %4982 = vmatpush2.bf16.msra.mxu1 %v6765_v54  ;;  %4940 = vmatprep.subr.bf16.mxu0 %v6770_v14 }
 0x2b3   : > { %4983 = vmatprep.subr.bf16.mxu1 %v6773_v52 }
 0x2b5   : > { %4941 = vmatpush2.bf16.msra.mxu0 %v6768_v15 }
 0x2b6   : > { %4984 = vmatpush2.bf16.msra.mxu1 %v6771_v8  ;;  %4942 = vmatprep.subr.bf16.mxu0 %v6776_v16 }
 0x2b7   : > { %4985 = vmatprep.subr.bf16.mxu1 %v6779_v50 }
 0x2b9   : > { %4943 = vmatpush2.bf16.msra.mxu0 %v6774_v44 }
 0x2ba   : > { %4986 = vmatpush2.bf16.msra.mxu1 %v6777_v19  ;;  %4944 = vmatprep.subr.bf16.mxu0 %v6782_v20 }
 0x2bb   : > { %4987 = vmatprep.subr.bf16.mxu1 %v6785_v24 }
 0x2bd   : > { %4945 = vmatpush2.bf16.msra.mxu0 %v6780_v62 }
 0x2be   : > { %4988 = vmatpush2.bf16.msra.mxu1 %v6783_v25  ;;  %4946 = vmatprep.subr.bf16.mxu0 %v6788_v12 }
 0x2bf   : > { %4989 = vmatprep.subr.bf16.mxu1 %v6791_v13 }
 0x2c1   : > { %4947 = vmatpush2.bf16.msra.mxu0 %v6786_v32 }
 0x2c2   : > { %4990 = vmatpush2.bf16.msra.mxu1 %v6789_v58  ;;  %4948 = vmatprep.subr.bf16.mxu0 %v6794_v59 }
 0x2c3   : > { %4991 = vmatprep.subr.bf16.mxu1 %v6797_v51 }
 0x2c5   : > { %4949 = vmatpush2.bf16.msra.mxu0 %v6792_v6 }
 0x2c6   : > { %4992 = vmatpush2.bf16.msra.mxu1 %v6795_v10  ;;  %4950 = vmatprep.subr.bf16.mxu0 %v6800_v63 }
 0x2c7   : > { %4993 = vmatprep.subr.bf16.mxu1 %v6803_v17 }
 0x2c9   : > { %4951 = vmatpush2.bf16.msra.mxu0 %v6798_v0 }
 0x2ca   : > { %4994 = vmatpush2.bf16.msra.mxu1 %v6801_v33  ;;  %4952 = vmatprep.subr.bf16.mxu0 %v6806_v1 }
 0x2cb   : > { %4995 = vmatprep.subr.bf16.mxu1 %v6809_v45 }
 0x2cd   : > { %4953 = vmatpush2.bf16.msra.mxu0 %v6804_v36 }
 0x2ce   : > { %4996 = vmatpush2.bf16.msra.mxu1 %v6807_v37 }
 0x2d0   : > { %4955 = vmatmul.mubr.bf16.vlgmr.msra.gmra.mxu0 %v7564_v60  ;;  %v4698_v18 = vpop.f32.mrf.mxu0 }
 0x2d1   : > { %4998 = vmatmul.mubr.bf16.vlgmr.msra.gmra.mxu1 %v7566_v61  ;;  %v4741_v34 = vpop.f32.mrf.mxu1  ;;  %v942_v61 = vsub.s32 3, %v7762_v21  ;;  %v4699_v53 = vadd.f32 %v4698_v18, %v4656_v4  ;;  %v4660_v21 = vadd.f32 %v4659_v26, %v4617_v5 }
 0x2d2   : > { %v4700_v39 = vpop.f32.mrf.mxu0 }
 0x2d3   : > { %v4743_v30 = vpop.f32.mrf.mxu1  ;;  %v943_v27 = vrot.slane %v7776_v47, %v942_v61  ;;  %v4742_v50 = vadd.f32 %v4741_v34, %v4699_v53 }
 0x2d4   : > { %v4702_v31 = vpop.f32.mrf.mxu0 }
 0x2d5   : > { %v4745_v42 = vpop.f32.mrf.mxu1  ;;  %v4615_v28 = vadd.f32 %v4614_v41, %v943_v27  ;;  %v4619_v43 = vadd.f32 %v4618_v22, %v943_v27  ;;  %v4703_v47 = vadd.f32 %v4702_v31, %v4660_v21  ;;  %v5040_v27 = vld [vmem:[%s7846_s30 + $0x8] sm:$0xff] (%p8022_p7) }
 0x2d6   : > { %v4704_v46 = vpop.f32.mrf.mxu0  ;;  %5041 = vst [vmem:[%s5025_s25 + $0x8] sm:$0xff] (%p8022_p7), %v5040_v27 }
 0x2d7   : > { %v4747_v60 = vpop.f32.mrf.mxu1  ;;  %v4658_v9 = vadd.f32 %v4657_v7, %v4615_v28  ;;  %v4662_v16 = vadd.f32 %v4661_v23, %v4619_v43  ;;  %v4746_v25 = vadd.f32 %v4745_v42, %v4703_v47  ;;  %v5048_v28 = vld [vmem:[%s7846_s30 + $0x28] sm:$0xff] (%p8022_p7) }
 0x2d8   : > { %5049 = vst [vmem:[%s5025_s25 + $0x48] sm:$0xff] (%p8022_p7), %v5048_v28 }
 0x2d9   : > { %v4701_v52 = vadd.f32 %v4700_v39, %v4658_v9  ;;  %v4705_v19 = vadd.f32 %v4704_v46, %v4662_v16 }
 0x2db   : > { %v4744_v44 = vadd.f32 %v4743_v30, %v4701_v52  ;;  %v4748_v13 = vadd.f32 %v4747_v60, %v4705_v19 }
 0x310   : > { %v4784_v48 = vpop.f32.mrf.mxu0 }
 0x311   : > { %v4827_v55 = vpop.f32.mrf.mxu1  ;;  %v4785_v20 = vadd.f32 %v4784_v48, %v4742_v50 }
 0x312   : > { %v4786_v49 = vpop.f32.mrf.mxu0 }
 0x313   : > { %v4829_v35 = vpop.f32.mrf.mxu1  ;;  %v4787_v12 = vadd.f32 %v4786_v49, %v4744_v44  ;;  %v4828_v32 = vadd.f32 %v4827_v55, %v4785_v20 }
 0x314   : > { %v4788_v2 = vpop.f32.mrf.mxu0 }
 0x315   : > { %v4831_v3 = vpop.f32.mrf.mxu1  ;;  %v4789_v58 = vadd.f32 %v4788_v2, %v4746_v25  ;;  %v4830_v6 = vadd.f32 %v4829_v35, %v4787_v12 }
 0x316   : > { %v4790_v54 = vpop.f32.mrf.mxu0 }
 0x317   : > { %v4833_v14 = vpop.f32.mrf.mxu1  ;;  %v4791_v10 = vadd.f32 %v4790_v54, %v4748_v13  ;;  %v4832_v17 = vadd.f32 %v4831_v3, %v4789_v58 }
 0x319   : > { %v4834_v45 = vadd.f32 %v4833_v14, %v4791_v10 }
 0x350   : > { %v4870_v15 = vpop.f32.mrf.mxu0 }
 0x351   : > { %v4913_v8 = vpop.f32.mrf.mxu1  ;;  %v4871_v63 = vadd.f32 %v4870_v15, %v4828_v32 }
 0x352   : > { %v4872_v24 = vpop.f32.mrf.mxu0 }
 0x353   : > { %v4915_v62 = vpop.f32.mrf.mxu1  ;;  %v4873_v0 = vadd.f32 %v4872_v24, %v4830_v6  ;;  %v4914_v36 = vadd.f32 %v4913_v8, %v4871_v63 }
 0x354   : > { %v4874_v59 = vpop.f32.mrf.mxu0 }
 0x355   : > { %v4917_v51 = vpop.f32.mrf.mxu1  ;;  %v4875_v37 = vadd.f32 %v4874_v59, %v4832_v17  ;;  %v4916_v41 = vadd.f32 %v4915_v62, %v4873_v0 }
 0x356   : > { %v4876_v33 = vpop.f32.mrf.mxu0 }
 0x357   : > { %v4919_v1 = vpop.f32.mrf.mxu1  ;;  %v4877_v7 = vadd.f32 %v4876_v33, %v4834_v45  ;;  %v4918_v23 = vadd.f32 %v4917_v51, %v4875_v37 }
 0x359   : > { %v4920_v31 = vadd.f32 %v4919_v1, %v4877_v7 }
 0x390   : > { %v4956_v38 = vpop.f32.mrf.mxu0 }
 0x391   : > { %v4999_v29 = vpop.f32.mrf.mxu1  ;;  %v4957_v11 = vadd.f32 %v4956_v38, %v4914_v36 }
 0x392   : > { %v4958_v26 = vpop.f32.mrf.mxu0 }
 0x393   : > { %v5001_v22 = vpop.f32.mrf.mxu1  ;;  %v5000_v18 = vadd.f32 %v4999_v29, %v4957_v11  ;;  %v4959_v34 = vadd.f32 %v4958_v26, %v4916_v41 }
 0x394   : > { %v4960_v39 = vpop.f32.mrf.mxu0 }
 0x395   : > { %v5003_v30 = vpop.f32.mrf.mxu1  ;;  %5010 = vst [vmem:[%s7846_s30 + $0x10] sm:$0xff] %v5000_v18  ;;  %v5002_v42 = vadd.f32 %v5001_v22, %v4959_v34  ;;  %v4961_v40 = vadd.f32 %v4960_v39, %v4918_v23 }
 0x396   : > { %v4962_v46 = vpop.f32.mrf.mxu0 }
 0x397   : > { %5011 = vst [vmem:[%s7846_s30 + $0x18] sm:$0xff] %v5002_v42  ;;  %v5004_v60 = vadd.f32 %v5003_v30, %v4961_v40  ;;  %v4963_v61 = vadd.f32 %v4962_v46, %v4920_v31  ;;  %v5005_v48 = vpop.f32.mrf.mxu1  ;;  %5022 = sbr.rel (!%p8022_p7) target bundleno = 932 (0x3a4), region = 44 }
 0x399   : > { %5014 = vst [vmem:[%s7846_s30 + $0x30] sm:$0xff] %v5004_v60  ;;  %v5006_v55 = vadd.f32 %v5005_v48, %v4963_v61 }
 0x39b   : > { %5015 = vst [vmem:[%s7846_s30 + $0x38] sm:$0xff] %v5006_v55 }
 0x39c   : > { %v5042_v49 = vld [vmem:[%s7846_s30 + $0x10] sm:$0xff] }
 0x39d   : > { %5043 = vst [vmem:[%s5025_s25 + $0x10] sm:$0xff] %v5042_v49 }
 0x39e   : > { %v5044_v35 = vld [vmem:[%s7846_s30 + $0x18] sm:$0xff] }
 0x39f   : > { %5045 = vst [vmem:[%s5025_s25 + $0x18] sm:$0xff] %v5044_v35 }
 0x3a0   : > { %v5050_v2 = vld [vmem:[%s7846_s30 + $0x30] sm:$0xff] }
 0x3a1   : > { %5051 = vst [vmem:[%s5025_s25 + $0x50] sm:$0xff] %v5050_v2 }
 0x3a2   : > { %v5052_v3 = vld [vmem:[%s7846_s30 + $0x38] sm:$0xff] }
 0x3a3   : > { %5053 = vst [vmem:[%s5025_s25 + $0x58] sm:$0xff] %v5052_v3 }
 0x3a4 PF: > { %p16_p10 = scmp.ge.s32.totalorder %s6953_s17, 4   ;;  %s8023_s12 = smov %s6896_s13 }
 0x3a5   : > { %s8024_s13 = smov %s6900_s14  ;;  %s8025_s14 = smov %s6963_s20 }
 0x3a6   : > { %s8026_s15 = smov %s6953_s17  ;;  %18 = sbr.rel (!%p16_p10) target bundleno = 5 (0x5), region = 108 }
 0x3ab   :  { %5069 = vsyncpa [#allocation3], 1 }
 0x3ac   :  { %5071 = vsyncpa [#allocation3 + $0x1], 1 }
 0x3ad   :  { %5072 = vsyncpa [#allocation5], 1 }
 0x3ae   :  { %5074 = vsyncpa [#allocation5 + $0x1], 1 }

</bundles_post_ra>
